<compile_context>
chip_gen: v7x
topology: tpu7x:2x2x1
jax: 0.10.0
libtpu: 0.0.40
codegen_flags: <defaults>
</compile_context>

<pallas_src>
import functools

import jax
import jax.numpy as jnp
import numpy as np
from jax.experimental import pallas as pl
from jax.experimental.pallas import tpu as pltpu


def rnn_event_kernel(tmax_ref,      # scalar prefetch: (1,) int32 in SMEM
                     x_ref,         # (W*bn, E)   rows ordered (t, n) within the block
                     len_ref,       # (bn, 1) int32
                     wih_ref,       # (E, 6H)   columns [r_f|r_b|z_f|z_b|n_f|n_b]
                     whh_ref,       # (2H, 6H)  block-diagonal per direction
                     b_ref,         # (2, 6H)   row0: input-side bias, row1: b_hn (0 on r/z cols)
                     wp_ref,        # (2H, P)
                     bp_ref,        # (1, P)
                     out_ref,       # (bn, P)
                     xproj_ref,     # VMEM scratch (W*bn, 6H) f32
                     *, W, H):
    bn = len_ref.shape[0]
    H2 = 2 * H
    H4 = 4 * H
    H6 = 6 * H

    wih = wih_ref[...]
    whh = whh_ref[...]
    bx = b_ref[0:1, :]                               # (1, 6H)
    bh = b_ref[1:2, :]                               # (1, 6H)

    # ---- hoisted input projection: one MXU matmul for all W timesteps ----
    xproj_ref[...] = (jnp.dot(x_ref[...], wih, preferred_element_type=jnp.float32)
                      + bx)

    L = len_ref[...]                                 # (bn, 1) int32
    tmax = tmax_ref[0]

    # column selectors (hoisted; the W-loop below is fully unrolled)
    col6 = jax.lax.broadcasted_iota(jnp.int32, (bn, H6), 1)
    fwd_cols = (col6 % H2) < H                       # True on forward gate columns
    col2 = jax.lax.broadcasted_iota(jnp.int32, (bn, H2), 1)
    is_fwd_half = col2 < H                           # True on the h_fwd half

    h = jnp.zeros((bn, H2), jnp.float32)             # [h_fwd | h_bwd]
    for t in range(W):                               # W small & static: unrolled
        tb = W - 1 - t
        xa = xproj_ref[pl.ds(t * bn, bn), :]         # forward reads timestep t
        xb = xproj_ref[pl.ds(tb * bn, bn), :]        # backward reads timestep W-1-t
        gx = jnp.where(fwd_cols, xa, xb)             # (bn, 6H)
        gh = jnp.dot(h, whh, preferred_element_type=jnp.float32) + bh
        rz = jax.nn.sigmoid(gx[:, :H4] + gh[:, :H4])           # (bn, 4H): [r | z]
        r = rz[:, :H2]
        z = rz[:, H2:]
        n = jnp.tanh(gx[:, H4:] + r * gh[:, H4:])              # (bn, 2H)
        h_new = (1.0 - z) * n + z * h
        # packed-sequence semantics: hidden only updates while step < length
        h_f_upd = jnp.where(t < L, h_new, h)
        h_b_upd = jnp.where(tb < L, h_new, h)
        h = jnp.where(is_fwd_half, h_f_upd, h_b_upd)

    # pad_packed_sequence zero-pads: forward slot at t = tmax-1 is 0 unless len == tmax
    h_keep_f = jnp.where(L == tmax, h, 0.0)
    h = jnp.where(is_fwd_half, h_keep_f, h)

    # fused post_encode_proj on cat([fwd, bwd])
    out_ref[...] = (jnp.dot(h, wp_ref[...], preferred_element_type=jnp.float32)
                    + bp_ref[...])


def _pack_params(params):
    """Consolidate the 13 PyTorch-style tensors into 5 kernel arrays."""
    f32 = jnp.float32
    H = params["whh_f"].shape[-1]
    zH = jnp.zeros((H, H), f32)
    zb = jnp.zeros((1, H), f32)

    wih_cols, whh_cols, bx_cols, bh_cols = [], [], [], []
    for g in range(3):                                # gate order r, z, n
        wih_cols += [params["wih_f"][g].astype(f32), params["wih_b"][g].astype(f32)]
        whh_cols += [jnp.concatenate([params["whh_f"][g].astype(f32), zH], axis=0),
                     jnp.concatenate([zH, params["whh_b"][g].astype(f32)], axis=0)]
        if g < 2:                                     # r, z: pre-sum input + hidden biases
            bx_cols += [params["bih_f"][g] + params["bhh_f"][g],
                        params["bih_b"][g] + params["bhh_b"][g]]
            bh_cols += [zb, zb]
        else:                                         # n: b_hn must stay inside r*(...)
            bx_cols += [params["bih_f"][g], params["bih_b"][g]]
            bh_cols += [params["bhh_f"][g], params["bhh_b"][g]]

    wih = jnp.concatenate(wih_cols, axis=1).astype(f32)                 # (E, 6H)
    whh = jnp.concatenate(whh_cols, axis=1).astype(f32)                 # (2H, 6H)
    bx = jnp.concatenate(bx_cols, axis=1).astype(f32)                   # (1, 6H)
    bh = jnp.concatenate(bh_cols, axis=1).astype(f32)                   # (1, 6H)
    b2 = jnp.concatenate([bx, bh], axis=0)                              # (2, 6H)
    wp = jnp.concatenate([params["wp_f"], params["wp_b"]], axis=0).astype(f32)  # (2H, P)
    bp = params["bp"].astype(f32)                                       # (1, P)
    return wih, whh, b2, wp, bp


def _ceil_to(x, m):
    return ((x + m - 1) // m) * m


def rnn_event_encoder(all_codes_embs, input_ids, params, *, block_n=128):
    B, S, _ = input_ids.shape
    N, W, E = all_codes_embs.shape
    H = params["whh_f"].shape[-1]
    P = params["bp"].shape[-1]
    assert N == B * S

    # glue: per-row lengths, identical to torch.argmin(first occurrence) + clamp>=1
    flat_ids = input_ids.reshape(N, -1)
    lengths = jnp.argmin(flat_ids, axis=1).astype(jnp.int32)
    lengths = jnp.where(lengths > 0, lengths, 1)
    tmax = jnp.max(lengths).reshape(1)                                  # scalar prefetch

    # row tiling: shrink block_n for tiny N, pad N so the grid divides evenly
    # (keep N_pad//bn >= 2 at large N so v7x's two TensorCores both get work)
    bn = _ceil_to(min(block_n, _ceil_to(N, 8)), 8)
    N_pad = _ceil_to(N, bn)
    nb = N_pad // bn

    x_p = all_codes_embs.astype(jnp.float32)
    if N_pad != N:
        x_p = jnp.pad(x_p, ((0, N_pad - N), (0, 0), (0, 0)))
        lengths = jnp.pad(lengths, (0, N_pad - N), constant_values=1)
    len_col = lengths[:, None]                                          # (N_pad, 1)

    # glue: group rows per grid block, time-major inside a block so the kernel
    # sees one contiguous (W*bn, E) tile: row (i, t, n) -> i*W*bn + t*bn + n
    x_blk = x_p.reshape(nb, bn, W, E).transpose(0, 2, 1, 3).reshape(nb * W * bn, E)

    wih, whh, b2, wp, bp = _pack_params(params)

    def full_spec(shape):
        n = len(shape)
        return pl.BlockSpec(shape, lambda *_, n=n: (0,) * n)

    kernel = functools.partial(rnn_event_kernel, W=W, H=H)
    out = pl.pallas_call(
        kernel,
        out_shape=jax.ShapeDtypeStruct((N_pad, P), jnp.float32),
        grid_spec=pltpu.PrefetchScalarGridSpec(
            num_scalar_prefetch=1,
            grid=(nb,),
            in_specs=[
                pl.BlockSpec((W * bn, E), lambda i, *_: (i, 0)),
                pl.BlockSpec((bn, 1), lambda i, *_: (i, 0)),
                full_spec((E, 6 * H)),
                full_spec((2 * H, 6 * H)),
                full_spec((2, 6 * H)),
                full_spec((2 * H, P)),
                full_spec((1, P)),
            ],
            out_specs=pl.BlockSpec((bn, P), lambda i, *_: (i, 0)),
            scratch_shapes=[pltpu.VMEM((W * bn, 6 * H), jnp.float32)],
        ),
        compiler_params=pltpu.CompilerParams(dimension_semantics=("parallel",)),
    )(tmax, x_blk, len_col, wih, whh, b2, wp, bp)

    return out[:N].reshape(B, S, P)


def reference_forward(all_codes_embs, input_ids, params):
    """Pure-JAX reference mirroring the PyTorch forward (for verification)."""
    B, S, _ = input_ids.shape
    N, W, E = all_codes_embs.shape
    H = params["whh_f"].shape[-1]

    flat_ids = input_ids.reshape(N, -1)
    lengths = jnp.argmin(flat_ids, axis=1).astype(jnp.int32)
    lengths = jnp.where(lengths > 0, lengths, 1)
    tmax = jnp.max(lengths)
    L = lengths[:, None]

    hp = jax.lax.Precision.HIGHEST

    def cell(x_t, h, wih, whh, bih, bhh):
        r = jax.nn.sigmoid(jnp.dot(x_t, wih[0], precision=hp) + bih[0]
                           + jnp.dot(h, whh[0], precision=hp) + bhh[0])
        z = jax.nn.sigmoid(jnp.dot(x_t, wih[1], precision=hp) + bih[1]
                           + jnp.dot(h, whh[1], precision=hp) + bhh[1])
        n = jnp.tanh(jnp.dot(x_t, wih[2], precision=hp) + bih[2]
                     + r * (jnp.dot(h, whh[2], precision=hp) + bhh[2]))
        return (1.0 - z) * n + z * h

    def run(reverse, wih, whh, bih, bhh):
        h = jnp.zeros((N, H), jnp.float32)
        ts = range(W - 1, -1, -1) if reverse else range(W)
        for t in ts:
            h_new = cell(all_codes_embs[:, t, :], h, wih, whh, bih, bhh)
            h = jnp.where(t < L, h_new, h)
        return h

    h_f = run(False, params["wih_f"], params["whh_f"], params["bih_f"], params["bhh_f"])
    h_b = run(True, params["wih_b"], params["whh_b"], params["bih_b"], params["bhh_b"])
    h_f = jnp.where(L == tmax, h_f, 0.0)
    out = (jnp.dot(h_f, params["wp_f"], precision=hp)
           + jnp.dot(h_b, params["wp_b"], precision=hp)
           + params["bp"])
    return out.reshape(B, S, -1)


if __name__ == "__main__":
    # args: embed_dim=16, pred_dim=32, n_layers=2 (-> 1 GRU layer), max_word_len=8
    B, S, W = 2, 8, 8
    E, H = 16, 32
    P = H
    N = B * S

    key = jax.random.PRNGKey(0)
    keys = jax.random.split(key, 14)

    k_gru = 1.0 / np.sqrt(H)          # PyTorch GRU init scale
    k_lin = 1.0 / np.sqrt(2 * H)      # PyTorch Linear(2H -> P) init scale
    u = lambda k, shp, sc: jax.random.uniform(k, shp, jnp.float32, -sc, sc)

    params = {
        "wih_f": u(keys[0], (3, E, H), k_gru), "whh_f": u(keys[1], (3, H, H), k_gru),
        "bih_f": u(keys[2], (3, 1, H), k_gru), "bhh_f": u(keys[3], (3, 1, H), k_gru),
        "wih_b": u(keys[4], (3, E, H), k_gru), "whh_b": u(keys[5], (3, H, H), k_gru),
        "bih_b": u(keys[6], (3, 1, H), k_gru), "bhh_b": u(keys[7], (3, 1, H), k_gru),
        "wp_f":  u(keys[8], (H, P), k_lin),
        "wp_b":  u(keys[9], (H, P), k_lin),
        "bp":    u(keys[10], (1, P), k_lin),
    }

    # synthetic token ids with zero padding so argmin-based lengths are meaningful
    ids = jax.random.randint(keys[11], (B, S, W), 1, 100, dtype=jnp.int32)
    row_len = jax.random.randint(keys[12], (B, S), 2, W + 1, dtype=jnp.int32)
    valid = jnp.arange(W, dtype=jnp.int32)[None, None, :] < row_len[:, :, None]
    input_ids = jnp.where(valid, ids, 0)

    all_codes_embs = jax.random.normal(keys[13], (N, W, E), jnp.float32)

    out = rnn_event_encoder(all_codes_embs, input_ids, params)
    out = jax.block_until_ready(out)
    assert out.shape == (B, S, P), out.shape

    ref = reference_forward(all_codes_embs, input_ids, params)
    np.testing.assert_allclose(np.asarray(out), np.asarray(ref), atol=5e-3, rtol=5e-3)

    print("KERNEL_OK")
</pallas_src>

<mosaic_0001>
module attributes {stable_mosaic.version = 11 : i64} {
  func.func @rnn_event_kernel(%arg0: i32, %arg1: memref<1xi32, #tpu.memory_space<smem>>, %arg2: memref<128x16xf32, #tpu.memory_space<vmem>>, %arg3: memref<16x1xi32, #tpu.memory_space<vmem>>, %arg4: memref<16x192xf32, #tpu.memory_space<vmem>>, %arg5: memref<64x192xf32, #tpu.memory_space<vmem>>, %arg6: memref<2x192xf32, #tpu.memory_space<vmem>>, %arg7: memref<64x32xf32, #tpu.memory_space<vmem>>, %arg8: memref<1x32xf32, #tpu.memory_space<vmem>>, %arg9: memref<16x32xf32, #tpu.memory_space<vmem>>, %arg10: memref<128x192xf32, #tpu.memory_space<vmem>>) attributes {dimension_semantics = [#tpu.dimension_semantics<parallel>], iteration_bounds = array<i64: 1>, scalar_prefetch = 1 : i64, scratch_operands = 1 : i64, tpu.core_type = #tpu.core_type<tc>, window_params = [{transform_indices = @transform_0, window_bounds = array<i64: 128, 16>}, {transform_indices = @transform_1, window_bounds = array<i64: 16, 1>}, {pipeline_mode = #tpu.pipeline_mode<synchronous>, transform_indices = @transform_2, window_bounds = array<i64: 16, 192>}, {pipeline_mode = #tpu.pipeline_mode<synchronous>, transform_indices = @transform_3, window_bounds = array<i64: 64, 192>}, {pipeline_mode = #tpu.pipeline_mode<synchronous>, transform_indices = @transform_4, window_bounds = array<i64: 2, 192>}, {pipeline_mode = #tpu.pipeline_mode<synchronous>, transform_indices = @transform_5, window_bounds = array<i64: 64, 32>}, {pipeline_mode = #tpu.pipeline_mode<synchronous>, transform_indices = @transform_6, window_bounds = array<i64: 1, 32>}, {transform_indices = @transform_7, window_bounds = array<i64: 16, 32>}]} {
    %c0 = arith.constant 0 : index
    %c0_0 = arith.constant 0 : index
    %0 = vector.load %arg4[%c0, %c0_0] : memref<16x192xf32, #tpu.memory_space<vmem>>, vector<16x192xf32>
    %c0_1 = arith.constant 0 : index
    %c0_2 = arith.constant 0 : index
    %1 = vector.load %arg5[%c0_1, %c0_2] : memref<64x192xf32, #tpu.memory_space<vmem>>, vector<64x192xf32>
    %c0_3 = arith.constant 0 : index
    %c0_4 = arith.constant 0 : index
    %2 = vector.load %arg6[%c0_3, %c0_4] : memref<2x192xf32, #tpu.memory_space<vmem>>, vector<1x192xf32>
    %c1 = arith.constant 1 : index
    %c0_5 = arith.constant 0 : index
    %3 = vector.load %arg6[%c1, %c0_5] : memref<2x192xf32, #tpu.memory_space<vmem>>, vector<1x192xf32>
    %c0_6 = arith.constant 0 : index
    %c0_7 = arith.constant 0 : index
    %4 = vector.load %arg2[%c0_6, %c0_7] : memref<128x16xf32, #tpu.memory_space<vmem>>, vector<128x16xf32>
    %cst = arith.constant dense<0.000000e+00> : vector<128x192xf32>
    %5 = tpu.matmul %4, %0, %cst {dimension_numbers = #tpu.dot_dimension_numbers<[1], [0], [0], [1], [0, 0, 1, 1], [], []>} : vector<128x16xf32>, vector<16x192xf32>, vector<128x192xf32> -> vector<128x192xf32>
    %6 = vector.broadcast %2 : vector<1x192xf32> to vector<128x192xf32>
    %7 = arith.addf %5, %6 : vector<128x192xf32>
    %c0_8 = arith.constant 0 : index
    %c0_9 = arith.constant 0 : index
    %8 = vector.load %arg10[%c0_8, %c0_9] : memref<128x192xf32, #tpu.memory_space<vmem>>, vector<128x192xf32>
    tpu.vector_store %arg10[%c0_8, %c0_9], %7 {strides = array<i32>} : memref<128x192xf32, #tpu.memory_space<vmem>>, vector<128x192xf32>,
    %c0_10 = arith.constant 0 : index
    %c0_11 = arith.constant 0 : index
    %9 = vector.load %arg3[%c0_10, %c0_11] : memref<16x1xi32, #tpu.memory_space<vmem>>, vector<16x1xi32>
    %c0_12 = arith.constant 0 : index
    %10 = memref.load %arg1[%c0_12] : memref<1xi32, #tpu.memory_space<smem>>
    %11 = tpu.iota {dimensions = array<i32: 1>} : vector<16x192xi32>
    %c64_i32 = arith.constant 64 : i32
    %c0_i32 = arith.constant 0 : i32
    %12 = arith.cmpi eq, %c64_i32, %c0_i32 : i32
    %c1_i32 = arith.constant 1 : i32
    %13 = arith.select %12, %c1_i32, %c64_i32 : i32
    %14 = vector.broadcast %13 : i32 to vector<16x192xi32>
    %15 = arith.remsi %11, %14 : vector<16x192xi32>
    %c0_i32_13 = arith.constant 0 : i32
    %16 = vector.broadcast %c0_i32_13 : i32 to vector<16x192xi32>
    %17 = arith.cmpi ne, %15, %16 : vector<16x192xi32>
    %c0_i32_14 = arith.constant 0 : i32
    %18 = vector.broadcast %c0_i32_14 : i32 to vector<16x192xi32>
    %19 = arith.cmpi slt, %15, %18 : vector<16x192xi32>
    %c0_i32_15 = arith.constant 0 : i32
    %20 = arith.cmpi slt, %13, %c0_i32_15 : i32
    %21 = vector.broadcast %20 : i1 to vector<16x192xi1>
    %22 = vector.broadcast %21 : vector<16x192xi1> to vector<16x192xi1>
    %23 = arith.xori %19, %22 : vector<16x192xi1>
    %24 = arith.andi %23, %17 : vector<16x192xi1>
    %25 = vector.broadcast %13 : i32 to vector<16x192xi32>
    %26 = arith.addi %15, %25 : vector<16x192xi32>
    %27 = arith.select %24, %26, %15 : vector<16x192xi1>, vector<16x192xi32>
    %c32_i32 = arith.constant 32 : i32
    %28 = vector.broadcast %c32_i32 : i32 to vector<16x192xi32>
    %29 = arith.cmpi slt, %27, %28 : vector<16x192xi32>
    %30 = tpu.iota {dimensions = array<i32: 1>} : vector<16x64xi32>
    %c32_i32_16 = arith.constant 32 : i32
    %31 = vector.broadcast %c32_i32_16 : i32 to vector<16x64xi32>
    %32 = arith.cmpi slt, %30, %31 : vector<16x64xi32>
    %cst_17 = arith.constant 0.000000e+00 : f32
    %33 = vector.broadcast %cst_17 : f32 to vector<16x64xf32>
    %c0_18 = arith.constant 0 : index
    %c0_19 = arith.constant 0 : index
    %34 = vector.load %arg10[%c0_18, %c0_19] : memref<128x192xf32, #tpu.memory_space<vmem>>, vector<16x192xf32>
    %c112 = arith.constant 112 : index
    %c0_20 = arith.constant 0 : index
    %35 = vector.load %arg10[%c112, %c0_20] : memref<128x192xf32, #tpu.memory_space<vmem>>, vector<16x192xf32>
    %36 = arith.select %29, %34, %35 : vector<16x192xi1>, vector<16x192xf32>
    %cst_21 = arith.constant dense<0.000000e+00> : vector<16x192xf32>
    %37 = tpu.matmul %33, %1, %cst_21 {dimension_numbers = #tpu.dot_dimension_numbers<[1], [0], [0], [1], [0, 0, 1, 1], [], []>} : vector<16x64xf32>, vector<64x192xf32>, vector<16x192xf32> -> vector<16x192xf32>
    %38 = vector.broadcast %3 : vector<1x192xf32> to vector<16x192xf32>
    %39 = arith.addf %37, %38 : vector<16x192xf32>
    %40 = vector.extract_strided_slice %36 {offsets = [0, 0], sizes = [16, 128], strides = [1, 1]} : vector<16x192xf32> to vector<16x128xf32>
    %41 = vector.extract_strided_slice %39 {offsets = [0, 0], sizes = [16, 128], strides = [1, 1]} : vector<16x192xf32> to vector<16x128xf32>
    %42 = arith.addf %40, %41 : vector<16x128xf32>
    %43 = arith.negf %42 : vector<16x128xf32>
    %44 = math.exp %43 : vector<16x128xf32>
    %cst_22 = arith.constant 1.000000e+00 : f32
    %45 = vector.broadcast %cst_22 : f32 to vector<16x128xf32>
    %46 = arith.addf %45, %44 : vector<16x128xf32>
    %47 = arith.divf %45, %46 : vector<16x128xf32>
    %48 = vector.extract_strided_slice %47 {offsets = [0, 0], sizes = [16, 64], strides = [1, 1]} : vector<16x128xf32> to vector<16x64xf32>
    %49 = vector.extract_strided_slice %47 {offsets = [0, 64], sizes = [16, 64], strides = [1, 1]} : vector<16x128xf32> to vector<16x64xf32>
    %50 = vector.extract_strided_slice %36 {offsets = [0, 128], sizes = [16, 64], strides = [1, 1]} : vector<16x192xf32> to vector<16x64xf32>
    %51 = vector.extract_strided_slice %39 {offsets = [0, 128], sizes = [16, 64], strides = [1, 1]} : vector<16x192xf32> to vector<16x64xf32>
    %52 = arith.mulf %48, %51 : vector<16x64xf32>
    %53 = arith.addf %50, %52 : vector<16x64xf32>
    %54 = math.tanh %53 : vector<16x64xf32>
    %cst_23 = arith.constant 1.000000e+00 : f32
    %55 = vector.broadcast %cst_23 : f32 to vector<16x64xf32>
    %56 = arith.subf %55, %49 : vector<16x64xf32>
    %57 = arith.mulf %56, %54 : vector<16x64xf32>
    %58 = arith.mulf %49, %33 : vector<16x64xf32>
    %59 = arith.addf %57, %58 : vector<16x64xf32>
    %c0_i32_24 = arith.constant 0 : i32
    %60 = vector.broadcast %c0_i32_24 : i32 to vector<16x1xi32>
    %61 = arith.cmpi sgt, %9, %60 : vector<16x1xi32>
    %62 = vector.shape_cast %61 : vector<16x1xi1> to vector<16x1xi1>
    %63 = vector.broadcast %62 : vector<16x1xi1> to vector<16x64xi1>
    %64 = arith.select %63, %59, %33 : vector<16x64xi1>, vector<16x64xf32>
    %c7_i32 = arith.constant 7 : i32
    %65 = vector.broadcast %c7_i32 : i32 to vector<16x1xi32>
    %66 = arith.cmpi sgt, %9, %65 : vector<16x1xi32>
    %67 = vector.shape_cast %66 : vector<16x1xi1> to vector<16x1xi1>
    %68 = vector.broadcast %67 : vector<16x1xi1> to vector<16x64xi1>
    %69 = arith.select %68, %59, %33 : vector<16x64xi1>, vector<16x64xf32>
    %70 = arith.select %32, %64, %69 : vector<16x64xi1>, vector<16x64xf32>
    %c16 = arith.constant 16 : index
    %c0_25 = arith.constant 0 : index
    %71 = vector.load %arg10[%c16, %c0_25] : memref<128x192xf32, #tpu.memory_space<vmem>>, vector<16x192xf32>
    %c96 = arith.constant 96 : index
    %c0_26 = arith.constant 0 : index
    %72 = vector.load %arg10[%c96, %c0_26] : memref<128x192xf32, #tpu.memory_space<vmem>>, vector<16x192xf32>
    %73 = arith.select %29, %71, %72 : vector<16x192xi1>, vector<16x192xf32>
    %cst_27 = arith.constant dense<0.000000e+00> : vector<16x192xf32>
    %74 = tpu.matmul %70, %1, %cst_27 {dimension_numbers = #tpu.dot_dimension_numbers<[1], [0], [0], [1], [0, 0, 1, 1], [], []>} : vector<16x64xf32>, vector<64x192xf32>, vector<16x192xf32> -> vector<16x192xf32>
    %75 = vector.broadcast %3 : vector<1x192xf32> to vector<16x192xf32>
    %76 = arith.addf %74, %75 : vector<16x192xf32>
    %77 = vector.extract_strided_slice %73 {offsets = [0, 0], sizes = [16, 128], strides = [1, 1]} : vector<16x192xf32> to vector<16x128xf32>
    %78 = vector.extract_strided_slice %76 {offsets = [0, 0], sizes = [16, 128], strides = [1, 1]} : vector<16x192xf32> to vector<16x128xf32>
    %79 = arith.addf %77, %78 : vector<16x128xf32>
    %80 = arith.negf %79 : vector<16x128xf32>
    %81 = math.exp %80 : vector<16x128xf32>
    %cst_28 = arith.constant 1.000000e+00 : f32
    %82 = vector.broadcast %cst_28 : f32 to vector<16x128xf32>
    %83 = arith.addf %82, %81 : vector<16x128xf32>
    %84 = arith.divf %82, %83 : vector<16x128xf32>
    %85 = vector.extract_strided_slice %84 {offsets = [0, 0], sizes = [16, 64], strides = [1, 1]} : vector<16x128xf32> to vector<16x64xf32>
    %86 = vector.extract_strided_slice %84 {offsets = [0, 64], sizes = [16, 64], strides = [1, 1]} : vector<16x128xf32> to vector<16x64xf32>
    %87 = vector.extract_strided_slice %73 {offsets = [0, 128], sizes = [16, 64], strides = [1, 1]} : vector<16x192xf32> to vector<16x64xf32>
    %88 = vector.extract_strided_slice %76 {offsets = [0, 128], sizes = [16, 64], strides = [1, 1]} : vector<16x192xf32> to vector<16x64xf32>
    %89 = arith.mulf %85, %88 : vector<16x64xf32>
    %90 = arith.addf %87, %89 : vector<16x64xf32>
    %91 = math.tanh %90 : vector<16x64xf32>
    %cst_29 = arith.constant 1.000000e+00 : f32
    %92 = vector.broadcast %cst_29 : f32 to vector<16x64xf32>
    %93 = arith.subf %92, %86 : vector<16x64xf32>
    %94 = arith.mulf %93, %91 : vector<16x64xf32>
    %95 = arith.mulf %86, %70 : vector<16x64xf32>
    %96 = arith.addf %94, %95 : vector<16x64xf32>
    %c1_i32_30 = arith.constant 1 : i32
    %97 = vector.broadcast %c1_i32_30 : i32 to vector<16x1xi32>
    %98 = arith.cmpi sgt, %9, %97 : vector<16x1xi32>
    %99 = vector.shape_cast %98 : vector<16x1xi1> to vector<16x1xi1>
    %100 = vector.broadcast %99 : vector<16x1xi1> to vector<16x64xi1>
    %101 = arith.select %100, %96, %70 : vector<16x64xi1>, vector<16x64xf32>
    %c6_i32 = arith.constant 6 : i32
    %102 = vector.broadcast %c6_i32 : i32 to vector<16x1xi32>
    %103 = arith.cmpi sgt, %9, %102 : vector<16x1xi32>
    %104 = vector.shape_cast %103 : vector<16x1xi1> to vector<16x1xi1>
    %105 = vector.broadcast %104 : vector<16x1xi1> to vector<16x64xi1>
    %106 = arith.select %105, %96, %70 : vector<16x64xi1>, vector<16x64xf32>
    %107 = arith.select %32, %101, %106 : vector<16x64xi1>, vector<16x64xf32>
    %c32 = arith.constant 32 : index
    %c0_31 = arith.constant 0 : index
    %108 = vector.load %arg10[%c32, %c0_31] : memref<128x192xf32, #tpu.memory_space<vmem>>, vector<16x192xf32>
    %c80 = arith.constant 80 : index
    %c0_32 = arith.constant 0 : index
    %109 = vector.load %arg10[%c80, %c0_32] : memref<128x192xf32, #tpu.memory_space<vmem>>, vector<16x192xf32>
    %110 = arith.select %29, %108, %109 : vector<16x192xi1>, vector<16x192xf32>
    %cst_33 = arith.constant dense<0.000000e+00> : vector<16x192xf32>
    %111 = tpu.matmul %107, %1, %cst_33 {dimension_numbers = #tpu.dot_dimension_numbers<[1], [0], [0], [1], [0, 0, 1, 1], [], []>} : vector<16x64xf32>, vector<64x192xf32>, vector<16x192xf32> -> vector<16x192xf32>
    %112 = vector.broadcast %3 : vector<1x192xf32> to vector<16x192xf32>
    %113 = arith.addf %111, %112 : vector<16x192xf32>
    %114 = vector.extract_strided_slice %110 {offsets = [0, 0], sizes = [16, 128], strides = [1, 1]} : vector<16x192xf32> to vector<16x128xf32>
    %115 = vector.extract_strided_slice %113 {offsets = [0, 0], sizes = [16, 128], strides = [1, 1]} : vector<16x192xf32> to vector<16x128xf32>
    %116 = arith.addf %114, %115 : vector<16x128xf32>
    %117 = arith.negf %116 : vector<16x128xf32>
    %118 = math.exp %117 : vector<16x128xf32>
    %cst_34 = arith.constant 1.000000e+00 : f32
    %119 = vector.broadcast %cst_34 : f32 to vector<16x128xf32>
    %120 = arith.addf %119, %118 : vector<16x128xf32>
    %121 = arith.divf %119, %120 : vector<16x128xf32>
    %122 = vector.extract_strided_slice %121 {offsets = [0, 0], sizes = [16, 64], strides = [1, 1]} : vector<16x128xf32> to vector<16x64xf32>
    %123 = vector.extract_strided_slice %121 {offsets = [0, 64], sizes = [16, 64], strides = [1, 1]} : vector<16x128xf32> to vector<16x64xf32>
    %124 = vector.extract_strided_slice %110 {offsets = [0, 128], sizes = [16, 64], strides = [1, 1]} : vector<16x192xf32> to vector<16x64xf32>
    %125 = vector.extract_strided_slice %113 {offsets = [0, 128], sizes = [16, 64], strides = [1, 1]} : vector<16x192xf32> to vector<16x64xf32>
    %126 = arith.mulf %122, %125 : vector<16x64xf32>
    %127 = arith.addf %124, %126 : vector<16x64xf32>
    %128 = math.tanh %127 : vector<16x64xf32>
    %cst_35 = arith.constant 1.000000e+00 : f32
    %129 = vector.broadcast %cst_35 : f32 to vector<16x64xf32>
    %130 = arith.subf %129, %123 : vector<16x64xf32>
    %131 = arith.mulf %130, %128 : vector<16x64xf32>
    %132 = arith.mulf %123, %107 : vector<16x64xf32>
    %133 = arith.addf %131, %132 : vector<16x64xf32>
    %c2_i32 = arith.constant 2 : i32
    %134 = vector.broadcast %c2_i32 : i32 to vector<16x1xi32>
    %135 = arith.cmpi sgt, %9, %134 : vector<16x1xi32>
    %136 = vector.shape_cast %135 : vector<16x1xi1> to vector<16x1xi1>
    %137 = vector.broadcast %136 : vector<16x1xi1> to vector<16x64xi1>
    %138 = arith.select %137, %133, %107 : vector<16x64xi1>, vector<16x64xf32>
    %c5_i32 = arith.constant 5 : i32
    %139 = vector.broadcast %c5_i32 : i32 to vector<16x1xi32>
    %140 = arith.cmpi sgt, %9, %139 : vector<16x1xi32>
    %141 = vector.shape_cast %140 : vector<16x1xi1> to vector<16x1xi1>
    %142 = vector.broadcast %141 : vector<16x1xi1> to vector<16x64xi1>
    %143 = arith.select %142, %133, %107 : vector<16x64xi1>, vector<16x64xf32>
    %144 = arith.select %32, %138, %143 : vector<16x64xi1>, vector<16x64xf32>
    %c48 = arith.constant 48 : index
    %c0_36 = arith.constant 0 : index
    %145 = vector.load %arg10[%c48, %c0_36] : memref<128x192xf32, #tpu.memory_space<vmem>>, vector<16x192xf32>
    %c64 = arith.constant 64 : index
    %c0_37 = arith.constant 0 : index
    %146 = vector.load %arg10[%c64, %c0_37] : memref<128x192xf32, #tpu.memory_space<vmem>>, vector<16x192xf32>
    %147 = arith.select %29, %145, %146 : vector<16x192xi1>, vector<16x192xf32>
    %cst_38 = arith.constant dense<0.000000e+00> : vector<16x192xf32>
    %148 = tpu.matmul %144, %1, %cst_38 {dimension_numbers = #tpu.dot_dimension_numbers<[1], [0], [0], [1], [0, 0, 1, 1], [], []>} : vector<16x64xf32>, vector<64x192xf32>, vector<16x192xf32> -> vector<16x192xf32>
    %149 = vector.broadcast %3 : vector<1x192xf32> to vector<16x192xf32>
    %150 = arith.addf %148, %149 : vector<16x192xf32>
    %151 = vector.extract_strided_slice %147 {offsets = [0, 0], sizes = [16, 128], strides = [1, 1]} : vector<16x192xf32> to vector<16x128xf32>
    %152 = vector.extract_strided_slice %150 {offsets = [0, 0], sizes = [16, 128], strides = [1, 1]} : vector<16x192xf32> to vector<16x128xf32>
    %153 = arith.addf %151, %152 : vector<16x128xf32>
    %154 = arith.negf %153 : vector<16x128xf32>
    %155 = math.exp %154 : vector<16x128xf32>
    %cst_39 = arith.constant 1.000000e+00 : f32
    %156 = vector.broadcast %cst_39 : f32 to vector<16x128xf32>
    %157 = arith.addf %156, %155 : vector<16x128xf32>
    %158 = arith.divf %156, %157 : vector<16x128xf32>
    %159 = vector.extract_strided_slice %158 {offsets = [0, 0], sizes = [16, 64], strides = [1, 1]} : vector<16x128xf32> to vector<16x64xf32>
    %160 = vector.extract_strided_slice %158 {offsets = [0, 64], sizes = [16, 64], strides = [1, 1]} : vector<16x128xf32> to vector<16x64xf32>
    %161 = vector.extract_strided_slice %147 {offsets = [0, 128], sizes = [16, 64], strides = [1, 1]} : vector<16x192xf32> to vector<16x64xf32>
    %162 = vector.extract_strided_slice %150 {offsets = [0, 128], sizes = [16, 64], strides = [1, 1]} : vector<16x192xf32> to vector<16x64xf32>
    %163 = arith.mulf %159, %162 : vector<16x64xf32>
    %164 = arith.addf %161, %163 : vector<16x64xf32>
    %165 = math.tanh %164 : vector<16x64xf32>
    %cst_40 = arith.constant 1.000000e+00 : f32
    %166 = vector.broadcast %cst_40 : f32 to vector<16x64xf32>
    %167 = arith.subf %166, %160 : vector<16x64xf32>
    %168 = arith.mulf %167, %165 : vector<16x64xf32>
    %169 = arith.mulf %160, %144 : vector<16x64xf32>
    %170 = arith.addf %168, %169 : vector<16x64xf32>
    %c3_i32 = arith.constant 3 : i32
    %171 = vector.broadcast %c3_i32 : i32 to vector<16x1xi32>
    %172 = arith.cmpi sgt, %9, %171 : vector<16x1xi32>
    %173 = vector.shape_cast %172 : vector<16x1xi1> to vector<16x1xi1>
    %174 = vector.broadcast %173 : vector<16x1xi1> to vector<16x64xi1>
    %175 = arith.select %174, %170, %144 : vector<16x64xi1>, vector<16x64xf32>
    %c4_i32 = arith.constant 4 : i32
    %176 = vector.broadcast %c4_i32 : i32 to vector<16x1xi32>
    %177 = arith.cmpi sgt, %9, %176 : vector<16x1xi32>
    %178 = vector.shape_cast %177 : vector<16x1xi1> to vector<16x1xi1>
    %179 = vector.broadcast %178 : vector<16x1xi1> to vector<16x64xi1>
    %180 = arith.select %179, %170, %144 : vector<16x64xi1>, vector<16x64xf32>
    %181 = arith.select %32, %175, %180 : vector<16x64xi1>, vector<16x64xf32>
    %c64_41 = arith.constant 64 : index
    %c0_42 = arith.constant 0 : index
    %182 = vector.load %arg10[%c64_41, %c0_42] : memref<128x192xf32, #tpu.memory_space<vmem>>, vector<16x192xf32>
    %c48_43 = arith.constant 48 : index
    %c0_44 = arith.constant 0 : index
    %183 = vector.load %arg10[%c48_43, %c0_44] : memref<128x192xf32, #tpu.memory_space<vmem>>, vector<16x192xf32>
    %184 = arith.select %29, %182, %183 : vector<16x192xi1>, vector<16x192xf32>
    %cst_45 = arith.constant dense<0.000000e+00> : vector<16x192xf32>
    %185 = tpu.matmul %181, %1, %cst_45 {dimension_numbers = #tpu.dot_dimension_numbers<[1], [0], [0], [1], [0, 0, 1, 1], [], []>} : vector<16x64xf32>, vector<64x192xf32>, vector<16x192xf32> -> vector<16x192xf32>
    %186 = vector.broadcast %3 : vector<1x192xf32> to vector<16x192xf32>
    %187 = arith.addf %185, %186 : vector<16x192xf32>
    %188 = vector.extract_strided_slice %184 {offsets = [0, 0], sizes = [16, 128], strides = [1, 1]} : vector<16x192xf32> to vector<16x128xf32>
    %189 = vector.extract_strided_slice %187 {offsets = [0, 0], sizes = [16, 128], strides = [1, 1]} : vector<16x192xf32> to vector<16x128xf32>
    %190 = arith.addf %188, %189 : vector<16x128xf32>
    %191 = arith.negf %190 : vector<16x128xf32>
    %192 = math.exp %191 : vector<16x128xf32>
    %cst_46 = arith.constant 1.000000e+00 : f32
    %193 = vector.broadcast %cst_46 : f32 to vector<16x128xf32>
    %194 = arith.addf %193, %192 : vector<16x128xf32>
    %195 = arith.divf %193, %194 : vector<16x128xf32>
    %196 = vector.extract_strided_slice %195 {offsets = [0, 0], sizes = [16, 64], strides = [1, 1]} : vector<16x128xf32> to vector<16x64xf32>
    %197 = vector.extract_strided_slice %195 {offsets = [0, 64], sizes = [16, 64], strides = [1, 1]} : vector<16x128xf32> to vector<16x64xf32>
    %198 = vector.extract_strided_slice %184 {offsets = [0, 128], sizes = [16, 64], strides = [1, 1]} : vector<16x192xf32> to vector<16x64xf32>
    %199 = vector.extract_strided_slice %187 {offsets = [0, 128], sizes = [16, 64], strides = [1, 1]} : vector<16x192xf32> to vector<16x64xf32>
    %200 = arith.mulf %196, %199 : vector<16x64xf32>
    %201 = arith.addf %198, %200 : vector<16x64xf32>
    %202 = math.tanh %201 : vector<16x64xf32>
    %cst_47 = arith.constant 1.000000e+00 : f32
    %203 = vector.broadcast %cst_47 : f32 to vector<16x64xf32>
    %204 = arith.subf %203, %197 : vector<16x64xf32>
    %205 = arith.mulf %204, %202 : vector<16x64xf32>
    %206 = arith.mulf %197, %181 : vector<16x64xf32>
    %207 = arith.addf %205, %206 : vector<16x64xf32>
    %c4_i32_48 = arith.constant 4 : i32
    %208 = vector.broadcast %c4_i32_48 : i32 to vector<16x1xi32>
    %209 = arith.cmpi sgt, %9, %208 : vector<16x1xi32>
    %210 = vector.shape_cast %209 : vector<16x1xi1> to vector<16x1xi1>
    %211 = vector.broadcast %210 : vector<16x1xi1> to vector<16x64xi1>
    %212 = arith.select %211, %207, %181 : vector<16x64xi1>, vector<16x64xf32>
    %c3_i32_49 = arith.constant 3 : i32
    %213 = vector.broadcast %c3_i32_49 : i32 to vector<16x1xi32>
    %214 = arith.cmpi sgt, %9, %213 : vector<16x1xi32>
    %215 = vector.shape_cast %214 : vector<16x1xi1> to vector<16x1xi1>
    %216 = vector.broadcast %215 : vector<16x1xi1> to vector<16x64xi1>
    %217 = arith.select %216, %207, %181 : vector<16x64xi1>, vector<16x64xf32>
    %218 = arith.select %32, %212, %217 : vector<16x64xi1>, vector<16x64xf32>
    %c80_50 = arith.constant 80 : index
    %c0_51 = arith.constant 0 : index
    %219 = vector.load %arg10[%c80_50, %c0_51] : memref<128x192xf32, #tpu.memory_space<vmem>>, vector<16x192xf32>
    %c32_52 = arith.constant 32 : index
    %c0_53 = arith.constant 0 : index
    %220 = vector.load %arg10[%c32_52, %c0_53] : memref<128x192xf32, #tpu.memory_space<vmem>>, vector<16x192xf32>
    %221 = arith.select %29, %219, %220 : vector<16x192xi1>, vector<16x192xf32>
    %cst_54 = arith.constant dense<0.000000e+00> : vector<16x192xf32>
    %222 = tpu.matmul %218, %1, %cst_54 {dimension_numbers = #tpu.dot_dimension_numbers<[1], [0], [0], [1], [0, 0, 1, 1], [], []>} : vector<16x64xf32>, vector<64x192xf32>, vector<16x192xf32> -> vector<16x192xf32>
    %223 = vector.broadcast %3 : vector<1x192xf32> to vector<16x192xf32>
    %224 = arith.addf %222, %223 : vector<16x192xf32>
    %225 = vector.extract_strided_slice %221 {offsets = [0, 0], sizes = [16, 128], strides = [1, 1]} : vector<16x192xf32> to vector<16x128xf32>
    %226 = vector.extract_strided_slice %224 {offsets = [0, 0], sizes = [16, 128], strides = [1, 1]} : vector<16x192xf32> to vector<16x128xf32>
    %227 = arith.addf %225, %226 : vector<16x128xf32>
    %228 = arith.negf %227 : vector<16x128xf32>
    %229 = math.exp %228 : vector<16x128xf32>
    %cst_55 = arith.constant 1.000000e+00 : f32
    %230 = vector.broadcast %cst_55 : f32 to vector<16x128xf32>
    %231 = arith.addf %230, %229 : vector<16x128xf32>
    %232 = arith.divf %230, %231 : vector<16x128xf32>
    %233 = vector.extract_strided_slice %232 {offsets = [0, 0], sizes = [16, 64], strides = [1, 1]} : vector<16x128xf32> to vector<16x64xf32>
    %234 = vector.extract_strided_slice %232 {offsets = [0, 64], sizes = [16, 64], strides = [1, 1]} : vector<16x128xf32> to vector<16x64xf32>
    %235 = vector.extract_strided_slice %221 {offsets = [0, 128], sizes = [16, 64], strides = [1, 1]} : vector<16x192xf32> to vector<16x64xf32>
    %236 = vector.extract_strided_slice %224 {offsets = [0, 128], sizes = [16, 64], strides = [1, 1]} : vector<16x192xf32> to vector<16x64xf32>
    %237 = arith.mulf %233, %236 : vector<16x64xf32>
    %238 = arith.addf %235, %237 : vector<16x64xf32>
    %239 = math.tanh %238 : vector<16x64xf32>
    %cst_56 = arith.constant 1.000000e+00 : f32
    %240 = vector.broadcast %cst_56 : f32 to vector<16x64xf32>
    %241 = arith.subf %240, %234 : vector<16x64xf32>
    %242 = arith.mulf %241, %239 : vector<16x64xf32>
    %243 = arith.mulf %234, %218 : vector<16x64xf32>
    %244 = arith.addf %242, %243 : vector<16x64xf32>
    %c5_i32_57 = arith.constant 5 : i32
    %245 = vector.broadcast %c5_i32_57 : i32 to vector<16x1xi32>
    %246 = arith.cmpi sgt, %9, %245 : vector<16x1xi32>
    %247 = vector.shape_cast %246 : vector<16x1xi1> to vector<16x1xi1>
    %248 = vector.broadcast %247 : vector<16x1xi1> to vector<16x64xi1>
    %249 = arith.select %248, %244, %218 : vector<16x64xi1>, vector<16x64xf32>
    %c2_i32_58 = arith.constant 2 : i32
    %250 = vector.broadcast %c2_i32_58 : i32 to vector<16x1xi32>
    %251 = arith.cmpi sgt, %9, %250 : vector<16x1xi32>
    %252 = vector.shape_cast %251 : vector<16x1xi1> to vector<16x1xi1>
    %253 = vector.broadcast %252 : vector<16x1xi1> to vector<16x64xi1>
    %254 = arith.select %253, %244, %218 : vector<16x64xi1>, vector<16x64xf32>
    %255 = arith.select %32, %249, %254 : vector<16x64xi1>, vector<16x64xf32>
    %c96_59 = arith.constant 96 : index
    %c0_60 = arith.constant 0 : index
    %256 = vector.load %arg10[%c96_59, %c0_60] : memref<128x192xf32, #tpu.memory_space<vmem>>, vector<16x192xf32>
    %c16_61 = arith.constant 16 : index
    %c0_62 = arith.constant 0 : index
    %257 = vector.load %arg10[%c16_61, %c0_62] : memref<128x192xf32, #tpu.memory_space<vmem>>, vector<16x192xf32>
    %258 = arith.select %29, %256, %257 : vector<16x192xi1>, vector<16x192xf32>
    %cst_63 = arith.constant dense<0.000000e+00> : vector<16x192xf32>
    %259 = tpu.matmul %255, %1, %cst_63 {dimension_numbers = #tpu.dot_dimension_numbers<[1], [0], [0], [1], [0, 0, 1, 1], [], []>} : vector<16x64xf32>, vector<64x192xf32>, vector<16x192xf32> -> vector<16x192xf32>
    %260 = vector.broadcast %3 : vector<1x192xf32> to vector<16x192xf32>
    %261 = arith.addf %259, %260 : vector<16x192xf32>
    %262 = vector.extract_strided_slice %258 {offsets = [0, 0], sizes = [16, 128], strides = [1, 1]} : vector<16x192xf32> to vector<16x128xf32>
    %263 = vector.extract_strided_slice %261 {offsets = [0, 0], sizes = [16, 128], strides = [1, 1]} : vector<16x192xf32> to vector<16x128xf32>
    %264 = arith.addf %262, %263 : vector<16x128xf32>
    %265 = arith.negf %264 : vector<16x128xf32>
    %266 = math.exp %265 : vector<16x128xf32>
    %cst_64 = arith.constant 1.000000e+00 : f32
    %267 = vector.broadcast %cst_64 : f32 to vector<16x128xf32>
    %268 = arith.addf %267, %266 : vector<16x128xf32>
    %269 = arith.divf %267, %268 : vector<16x128xf32>
    %270 = vector.extract_strided_slice %269 {offsets = [0, 0], sizes = [16, 64], strides = [1, 1]} : vector<16x128xf32> to vector<16x64xf32>
    %271 = vector.extract_strided_slice %269 {offsets = [0, 64], sizes = [16, 64], strides = [1, 1]} : vector<16x128xf32> to vector<16x64xf32>
    %272 = vector.extract_strided_slice %258 {offsets = [0, 128], sizes = [16, 64], strides = [1, 1]} : vector<16x192xf32> to vector<16x64xf32>
    %273 = vector.extract_strided_slice %261 {offsets = [0, 128], sizes = [16, 64], strides = [1, 1]} : vector<16x192xf32> to vector<16x64xf32>
    %274 = arith.mulf %270, %273 : vector<16x64xf32>
    %275 = arith.addf %272, %274 : vector<16x64xf32>
    %276 = math.tanh %275 : vector<16x64xf32>
    %cst_65 = arith.constant 1.000000e+00 : f32
    %277 = vector.broadcast %cst_65 : f32 to vector<16x64xf32>
    %278 = arith.subf %277, %271 : vector<16x64xf32>
    %279 = arith.mulf %278, %276 : vector<16x64xf32>
    %280 = arith.mulf %271, %255 : vector<16x64xf32>
    %281 = arith.addf %279, %280 : vector<16x64xf32>
    %c6_i32_66 = arith.constant 6 : i32
    %282 = vector.broadcast %c6_i32_66 : i32 to vector<16x1xi32>
    %283 = arith.cmpi sgt, %9, %282 : vector<16x1xi32>
    %284 = vector.shape_cast %283 : vector<16x1xi1> to vector<16x1xi1>
    %285 = vector.broadcast %284 : vector<16x1xi1> to vector<16x64xi1>
    %286 = arith.select %285, %281, %255 : vector<16x64xi1>, vector<16x64xf32>
    %c1_i32_67 = arith.constant 1 : i32
    %287 = vector.broadcast %c1_i32_67 : i32 to vector<16x1xi32>
    %288 = arith.cmpi sgt, %9, %287 : vector<16x1xi32>
    %289 = vector.shape_cast %288 : vector<16x1xi1> to vector<16x1xi1>
    %290 = vector.broadcast %289 : vector<16x1xi1> to vector<16x64xi1>
    %291 = arith.select %290, %281, %255 : vector<16x64xi1>, vector<16x64xf32>
    %292 = arith.select %32, %286, %291 : vector<16x64xi1>, vector<16x64xf32>
    %c112_68 = arith.constant 112 : index
    %c0_69 = arith.constant 0 : index
    %293 = vector.load %arg10[%c112_68, %c0_69] : memref<128x192xf32, #tpu.memory_space<vmem>>, vector<16x192xf32>
    %c0_70 = arith.constant 0 : index
    %c0_71 = arith.constant 0 : index
    %294 = vector.load %arg10[%c0_70, %c0_71] : memref<128x192xf32, #tpu.memory_space<vmem>>, vector<16x192xf32>
    %295 = arith.select %29, %293, %294 : vector<16x192xi1>, vector<16x192xf32>
    %cst_72 = arith.constant dense<0.000000e+00> : vector<16x192xf32>
    %296 = tpu.matmul %292, %1, %cst_72 {dimension_numbers = #tpu.dot_dimension_numbers<[1], [0], [0], [1], [0, 0, 1, 1], [], []>} : vector<16x64xf32>, vector<64x192xf32>, vector<16x192xf32> -> vector<16x192xf32>
    %297 = vector.broadcast %3 : vector<1x192xf32> to vector<16x192xf32>
    %298 = arith.addf %296, %297 : vector<16x192xf32>
    %299 = vector.extract_strided_slice %295 {offsets = [0, 0], sizes = [16, 128], strides = [1, 1]} : vector<16x192xf32> to vector<16x128xf32>
    %300 = vector.extract_strided_slice %298 {offsets = [0, 0], sizes = [16, 128], strides = [1, 1]} : vector<16x192xf32> to vector<16x128xf32>
    %301 = arith.addf %299, %300 : vector<16x128xf32>
    %302 = arith.negf %301 : vector<16x128xf32>
    %303 = math.exp %302 : vector<16x128xf32>
    %cst_73 = arith.constant 1.000000e+00 : f32
    %304 = vector.broadcast %cst_73 : f32 to vector<16x128xf32>
    %305 = arith.addf %304, %303 : vector<16x128xf32>
    %306 = arith.divf %304, %305 : vector<16x128xf32>
    %307 = vector.extract_strided_slice %306 {offsets = [0, 0], sizes = [16, 64], strides = [1, 1]} : vector<16x128xf32> to vector<16x64xf32>
    %308 = vector.extract_strided_slice %306 {offsets = [0, 64], sizes = [16, 64], strides = [1, 1]} : vector<16x128xf32> to vector<16x64xf32>
    %309 = vector.extract_strided_slice %295 {offsets = [0, 128], sizes = [16, 64], strides = [1, 1]} : vector<16x192xf32> to vector<16x64xf32>
    %310 = vector.extract_strided_slice %298 {offsets = [0, 128], sizes = [16, 64], strides = [1, 1]} : vector<16x192xf32> to vector<16x64xf32>
    %311 = arith.mulf %307, %310 : vector<16x64xf32>
    %312 = arith.addf %309, %311 : vector<16x64xf32>
    %313 = math.tanh %312 : vector<16x64xf32>
    %cst_74 = arith.constant 1.000000e+00 : f32
    %314 = vector.broadcast %cst_74 : f32 to vector<16x64xf32>
    %315 = arith.subf %314, %308 : vector<16x64xf32>
    %316 = arith.mulf %315, %313 : vector<16x64xf32>
    %317 = arith.mulf %308, %292 : vector<16x64xf32>
    %318 = arith.addf %316, %317 : vector<16x64xf32>
    %c7_i32_75 = arith.constant 7 : i32
    %319 = vector.broadcast %c7_i32_75 : i32 to vector<16x1xi32>
    %320 = arith.cmpi sgt, %9, %319 : vector<16x1xi32>
    %321 = vector.shape_cast %320 : vector<16x1xi1> to vector<16x1xi1>
    %322 = vector.broadcast %321 : vector<16x1xi1> to vector<16x64xi1>
    %323 = arith.select %322, %318, %292 : vector<16x64xi1>, vector<16x64xf32>
    %c0_i32_76 = arith.constant 0 : i32
    %324 = vector.broadcast %c0_i32_76 : i32 to vector<16x1xi32>
    %325 = arith.cmpi sgt, %9, %324 : vector<16x1xi32>
    %326 = vector.shape_cast %325 : vector<16x1xi1> to vector<16x1xi1>
    %327 = vector.broadcast %326 : vector<16x1xi1> to vector<16x64xi1>
    %328 = arith.select %327, %318, %292 : vector<16x64xi1>, vector<16x64xf32>
    %329 = arith.select %32, %323, %328 : vector<16x64xi1>, vector<16x64xf32>
    %330 = vector.broadcast %10 : i32 to vector<16x1xi32>
    %331 = arith.cmpi eq, %9, %330 : vector<16x1xi32>
    %cst_77 = arith.constant 0.000000e+00 : f32
    %332 = vector.shape_cast %331 : vector<16x1xi1> to vector<16x1xi1>
    %333 = vector.broadcast %332 : vector<16x1xi1> to vector<16x64xi1>
    %334 = vector.broadcast %cst_77 : f32 to vector<16x64xf32>
    %335 = arith.select %333, %329, %334 : vector<16x64xi1>, vector<16x64xf32>
    %336 = arith.select %32, %335, %329 : vector<16x64xi1>, vector<16x64xf32>
    %c0_78 = arith.constant 0 : index
    %c0_79 = arith.constant 0 : index
    %337 = vector.load %arg7[%c0_78, %c0_79] : memref<64x32xf32, #tpu.memory_space<vmem>>, vector<64x32xf32>
    %cst_80 = arith.constant dense<0.000000e+00> : vector<16x32xf32>
    %338 = tpu.matmul %336, %337, %cst_80 {dimension_numbers = #tpu.dot_dimension_numbers<[1], [0], [0], [1], [0, 0, 1, 1], [], []>} : vector<16x64xf32>, vector<64x32xf32>, vector<16x32xf32> -> vector<16x32xf32>
    %c0_81 = arith.constant 0 : index
    %c0_82 = arith.constant 0 : index
    %339 = vector.load %arg8[%c0_81, %c0_82] : memref<1x32xf32, #tpu.memory_space<vmem>>, vector<1x32xf32>
    %340 = vector.broadcast %339 : vector<1x32xf32> to vector<16x32xf32>
    %341 = arith.addf %338, %340 : vector<16x32xf32>
    %c0_83 = arith.constant 0 : index
    %c0_84 = arith.constant 0 : index
    %342 = vector.load %arg9[%c0_83, %c0_84] : memref<16x32xf32, #tpu.memory_space<vmem>>, vector<16x32xf32>
    tpu.vector_store %arg9[%c0_83, %c0_84], %341 {strides = array<i32>} : memref<16x32xf32, #tpu.memory_space<vmem>>, vector<16x32xf32>,
    return
  }
  func.func @transform_0(%arg0: i32, %arg1: memref<1xi32, #tpu.memory_space<smem>>) -> (i32, i32) {
    %c0_i32 = arith.constant 0 : i32
    %c0_i32_0 = arith.constant 0 : i32
    return %arg0, %c0_i32 : i32, i32
  }
  func.func @transform_1(%arg0: i32, %arg1: memref<1xi32, #tpu.memory_space<smem>>) -> (i32, i32) {
    %c0_i32 = arith.constant 0 : i32
    %c0_i32_0 = arith.constant 0 : i32
    return %arg0, %c0_i32 : i32, i32
  }
  func.func @transform_2(%arg0: i32, %arg1: memref<1xi32, #tpu.memory_space<smem>>) -> (i32, i32) {
    %c0_i32 = arith.constant 0 : i32
    %c0_i32_0 = arith.constant 0 : i32
    %c0_i32_1 = arith.constant 0 : i32
    return %c0_i32, %c0_i32_0 : i32, i32
  }
  func.func @transform_3(%arg0: i32, %arg1: memref<1xi32, #tpu.memory_space<smem>>) -> (i32, i32) {
    %c0_i32 = arith.constant 0 : i32
    %c0_i32_0 = arith.constant 0 : i32
    %c0_i32_1 = arith.constant 0 : i32
    return %c0_i32, %c0_i32_0 : i32, i32
  }
  func.func @transform_4(%arg0: i32, %arg1: memref<1xi32, #tpu.memory_space<smem>>) -> (i32, i32) {
    %c0_i32 = arith.constant 0 : i32
    %c0_i32_0 = arith.constant 0 : i32
    %c0_i32_1 = arith.constant 0 : i32
    return %c0_i32, %c0_i32_0 : i32, i32
  }
  func.func @transform_5(%arg0: i32, %arg1: memref<1xi32, #tpu.memory_space<smem>>) -> (i32, i32) {
    %c0_i32 = arith.constant 0 : i32
    %c0_i32_0 = arith.constant 0 : i32
    %c0_i32_1 = arith.constant 0 : i32
    return %c0_i32, %c0_i32_0 : i32, i32
  }
  func.func @transform_6(%arg0: i32, %arg1: memref<1xi32, #tpu.memory_space<smem>>) -> (i32, i32) {
    %c0_i32 = arith.constant 0 : i32
    %c0_i32_0 = arith.constant 0 : i32
    %c0_i32_1 = arith.constant 0 : i32
    return %c0_i32, %c0_i32_0 : i32, i32
  }
  func.func @transform_7(%arg0: i32, %arg1: memref<1xi32, #tpu.memory_space<smem>>) -> (i32, i32) {
    %c0_i32 = arith.constant 0 : i32
    %c0_i32_0 = arith.constant 0 : i32
    return %arg0, %c0_i32 : i32, i32
  }
}

</mosaic_0001>

<bundles_post_ra>
// kernel: tpu_custom_call.1
= control target key start
LH: loop header
LB: loop body
LE: loop exit
PB: predicated region body
PF: predicated region fallthrough
CT: control target
= control target key end

     0   :  { %v3233_v5 = vmov 0.0   ;;  %vm79_vm0 = vcmask 130048   ;;  %s3224_s0 = inlined_call_operand.<no memory space> [shape: s32[1], index: 0, kind: input, shape index: {}]   ;;  %s3225_s1 = inlined_call_operand.vmem [shape: f32[128,16], index: 1, kind: input, shape index: {}]   ;;  %s3226_s2 = inlined_call_operand.vmem [shape: s32[16,1], index: 2, kind: input, shape index: {}]   ;;  %s3227_s3 = inlined_call_operand.vmem [shape: f32[16,192], index: 3, kind: input, shape index: {}]   ;;  %s3228_s4 = inlined_call_operand.vmem [shape: f32[64,192], index: 4, kind: input, shape index: {}]   ;;  %s3229_s5 = inlined_call_operand.vmem [shape: f32[2,192], index: 5, kind: input, shape index: {}]   ;;  %s3230_s6 = inlined_call_operand.vmem [shape: f32[64,32], index: 6, kind: input, shape index: {}]   ;;  %s3231_s7 = inlined_call_operand.vmem [shape: f32[1,32], index: 7, kind: input, shape index: {}]   ;;  %s3232_s8 = inlined_call_operand.hbm [shape: f32[16,32], index: 8, kind: output, shape index: {}]  }
   0x1   :  { %v30_v0 = vld [vmem:[%s3227_s3 + $0x8] sm:$0xff]  ;;  %v32_v1 = vld [vmem:[%s3227_s3 + $0x18] sm:$0xff]  ;;  %v29_v2 = vld [vmem:[%s3227_s3] sm:$0xff]  ;;  %192 = vmatprep.mubr.f32.mxu0 %v3233_v5  ;;  %445 = vmatprep.mubr.f32.mxu1 %v3233_v5 }
   0x2   :  { %v1904_v3 = vpack.c.bf16 %v32_v1, %v30_v0  ;;  %v31_v4 = vld [vmem:[%s3227_s3 + $0x10] sm:$0xff]  ;;  %v52_v7 = vld [vmem:[%s3225_s1] sm:$0xff]  ;;  %v34_v8 = vld [vmem:[%s3228_s4 + $0x8] sm:$0xff] }
   0x3   :  { %v1906_v6 = vpack.c.bf16 %v31_v4, %v29_v2  ;;  %v36_v9 = vld [vmem:[%s3228_s4 + $0x18] sm:$0xff]  ;;  %v33_v10 = vld [vmem:[%s3228_s4] sm:$0xff]  ;;  %v35_v11 = vld [vmem:[%s3228_s4 + $0x10] sm:$0xff] }
   0x4   :  { %1905 = vmatprep.subr.bf16.mxu0 %v1904_v3  ;;  %v2263_v12 = vpack.c.bf16 %v36_v9, %v34_v8  ;;  %v2265_v13 = vpack.c.bf16 %v35_v11, %v33_v10  ;;  %v38_v14 = vld [vmem:[%s3228_s4 + $0x28] sm:$0xff]  ;;  %v40_v15 = vld [vmem:[%s3228_s4 + $0x38] sm:$0xff]  ;;  %v37_v18 = vld [vmem:[%s3228_s4 + $0x20] sm:$0xff] }
   0x5   :  { %1907 = vmatpush1.bf16.msra.mxu0 %v1906_v6  ;;  %v53_v16 = vld [vmem:[%s3225_s1 + $0x8] sm:$0xff]  ;;  %v2277_v17 = vpack.c.bf16 %v40_v15, %v38_v14  ;;  %v39_v19 = vld [vmem:[%s3228_s4 + $0x30] sm:$0xff]  ;;  %v44_v21 = vld [vmem:[%s3228_s4 + $0x58] sm:$0xff] }
   0x6   :  { %1909 = vmatprep.subr.bf16.mxu1 %v2263_v12  ;;  %v42_v20 = vld [vmem:[%s3228_s4 + $0x48] sm:$0xff]  ;;  %1973 = vmatprep.subr.bf16.mxu0 %v2263_v12  ;;  %v2294_v22 = vpack.c.bf16 %v39_v19, %v37_v18  ;;  %v54_v23 = vld [vmem:[%s3225_s1 + $0x10] sm:$0xff]  ;;  %v41_v25 = vld [vmem:[%s3228_s4 + $0x40] sm:$0xff] }
   0x7   :  { %1911 = vmatpush1.bf16.msra.mxu1 %v2265_v13  ;;  %v2302_v24 = vpack.c.bf16 %v44_v21, %v42_v20  ;;  %v43_v26 = vld [vmem:[%s3228_s4 + $0x50] sm:$0xff]  ;;  %v46_v27 = vld [vmem:[%s3228_s4 + $0x68] sm:$0xff]  ;;  %v48_v28 = vld [vmem:[%s3228_s4 + $0x78] sm:$0xff] }
   0x8   :  { %1826 = vmatmul.mubr.msk.f32.vlgmr.msra.gmra.mrb[0].mxu0 %vm79_vm0, %v52_v7  ;;  %1913 = vmatprep.subr.bf16.mxu1 %v2277_v17 }
   0x9   :  { %198 = vmatprep.mubr.f32.mxu0 %v3233_v5  ;;  %1975 = vmatpush1.bf16.msra.mxu0 %v2265_v13 }
   0xa   :  { %1977 = vmatprep.subr.bf16.mxu0 %v2277_v17 }
   0xc   :  { %1827 = vmatmul.mubr.msk.f32.gmra.mrb[2].mxu0 %vm79_vm0, %v53_v16 }
   0xd   :  { %204 = vmatprep.mubr.f32.mxu0 %v3233_v5 }
   0xe   :  { %14 = vsyncpa [#allocation6], 0  ;;  %1915 = vmatpush1.bf16.msra.mxu1 %v2294_v22  ;;  %v2319_v29 = vpack.c.bf16 %v43_v26, %v41_v25  ;;  %1979 = vmatpush1.bf16.msra.mxu0 %v2294_v22  ;;  %v2324_v30 = vpack.c.bf16 %v48_v28, %v46_v27  ;;  %v45_v31 = vld [vmem:[%s3228_s4 + $0x60] sm:$0xff]  ;;  %v47_v32 = vld [vmem:[%s3228_s4 + $0x70] sm:$0xff]  ;;  %v3235_v48 = vmov 0   ;;  %v69_v54 = vlaneseq  ;;  %s2185_s9 = smov [#allocation5]  }
   0xf   :  { %1917 = vmatprep.subr.bf16.mxu1 %v2302_v24  ;;  %v55_v33 = vld [vmem:[%s3225_s1 + $0x18] sm:$0xff]  ;;  %1981 = vmatprep.subr.bf16.mxu0 %v2302_v24  ;;  %v2338_v34 = vpack.c.bf16 %v47_v32, %v45_v31  ;;  %v56_v35 = vld [vmem:[%s3225_s1 + $0x20] sm:$0xff]  ;;  %v57_v36 = vld [vmem:[%s3225_s1 + $0x28] sm:$0xff]  ;;  %vm290_vm5 = vcmask 523264   ;;  %s1814_s10 = sshll.u32 %s2185_s9, 4  ;;  %s1815_s10 = int_to_ptr.vmem [resolvable:$true] %s1814_s10 }
  0x10   :  { %1828 = vmatmul.mubr.msk.f32.gmra.mrb[4].mxu0 %vm79_vm0, %v54_v23  ;;  %v58_v37 = vld [vmem:[%s3225_s1 + $0x30] sm:$0xff]  ;;  %v59_v38 = vld [vmem:[%s3225_s1 + $0x38] sm:$0xff]  ;;  %v60_v39 = vld [vmem:[%s3225_s1 + $0x40] sm:$0xff]  ;;  %2058 = vset.pattern.permute.xlu0 %v3235_v48  ;;  %v2441_v55 = vshrl.u32 %v69_v54, 7  ;;  %s2158_s11 = scalar_lea.vmem %s1815_s10, 256  ;;  %p2163_p1 = scmp.lt.s32.totalorder %s1815_s10, %s1815_s10 }
  0x11   :  { %210 = vmatprep.mubr.f32.mxu0 %v3233_v5  ;;  %v61_v40 = vld [vmem:[%s3225_s1 + $0x48] sm:$0xff]  ;;  %v62_v41 = vld [vmem:[%s3225_s1 + $0x50] sm:$0xff]  ;;  %v63_v42 = vld [vmem:[%s3225_s1 + $0x58] sm:$0xff]  ;;  %2059 = vset.pattern.permute.xlu1 %v3235_v48  ;;  %p2159_p0 = scmp.ne.s32.totalorder %s1815_s10, %s2158_s11  ;;  %p2164_p2 = scmp.lt.s32.totalorder %s2158_s11, %s2158_s11 }
  0x12   :  { %1919 = vmatpush1.bf16.msra.mxu1 %v2319_v29  ;;  %1983 = vmatpush1.bf16.msra.mxu0 %v2319_v29  ;;  %v64_v43 = vld [vmem:[%s3225_s1 + $0x60] sm:$0xff]  ;;  %v65_v44 = vld [vmem:[%s3225_s1 + $0x68] sm:$0xff]  ;;  %v66_v45 = vld [vmem:[%s3225_s1 + $0x70] sm:$0xff]  ;;  %v71_v56 = vsub.s32 0, %v2441_v55  ;;  %v75_v58 = vsub.s32 1, %v2441_v55 }
  0x13   :  { %1921 = vmatprep.subr.bf16.mxu1 %v2324_v30  ;;  %1985 = vmatprep.subr.bf16.mxu0 %v2324_v30  ;;  %v67_v46 = vld [vmem:[%s3225_s1 + $0x78] sm:$0xff]  ;;  %v2424_v47 = vld [vmem:[%s3226_s2] sm:$0xff]  ;;  %v2434_v50 = vld [vmem:[%s3226_s2 + $0x8] sm:$0xff]  ;;  %p2165_p3 = por %p2164_p2, %p2163_p1 }
  0x14   :  { %1829 = vmatmul.mubr.msk.f32.gmra.mrb[6].mxu0 %vm79_vm0, %v55_v33  ;;  %vm494_vm1 = vcmp.gt.s32.totalorder %v2424_v47, 0  ;;  %vm508_vm2 = vcmp.gt.s32.totalorder %v2424_v47, 7  ;;  %vm495_vm3 = vcmp.gt.s32.totalorder %v2434_v50, 0  ;;  %vm509_vm4 = vcmp.gt.s32.totalorder %v2434_v50, 7 }
  0x15   :  { %216 = vmatprep.mubr.f32.mxu0 %v3233_v5  ;;  %v496_v49 = vsel %vm494_vm1, 1, %v3235_v48  ;;  %v510_v51 = vsel %vm508_vm2, 1, %v3235_v48  ;;  %v497_v52 = vsel %vm495_vm3, 1, %v3235_v48  ;;  %v511_v53 = vsel %vm509_vm4, 1, %v3235_v48  ;;  %p2166_p4 = pnand %p2165_p3, %p2159_p0 }
  0x16   :  { %1923 = vmatpush1.bf16.msra.mxu1 %v2338_v34  ;;  %1987 = vmatpush1.bf16.msra.mxu0 %v2338_v34  ;;  %v49_v57 = vld [vmem:[%s3229_s5] ss:$2 sm:$0x3]  ;;  %vm691_vm12 = vcmp.gt.s32.totalorder %v2424_v47, 6  ;;  %vm677_vm13 = vcmp.gt.s32.totalorder %v2424_v47, 1  ;;  %vm692_vm14 = vcmp.gt.s32.totalorder %v2434_v50, 6 }
  0x17   :  { %1925 = vmatprep.subr.bf16.mxu1 %v2263_v12  ;;  %2005 = vmatprep.subr.bf16.mxu0 %v2263_v12  ;;  %v2450_v59 = vrot.slane %v49_v57, %v71_v56  ;;  %v2454_v60 = vrot.slane %v49_v57, %v75_v58  ;;  %vm678_vm15 = vcmp.gt.s32.totalorder %v2434_v50, 1 }
  0x18   :  { %1830 = vmatmul.mubr.msk.f32.gmra.mrb[8].mxu0 %vm79_vm0, %v56_v35  ;;  %499 = vperm.xlu0 %2058, %v496_v49   ;;  %v2494_v35 = vand.u32 127, %v69_v54 }
  0x19   :  { %222 = vmatprep.mubr.f32.mxu0 %v3233_v5  ;;  %446 = vmatmul.mubr.f32.vlgmr.msra.gmra.mrb[0].mxu1 %v3233_v5 }
  0x1a   :  { %451 = vmatprep.mubr.f32.mxu1 %v3233_v5  ;;  %1927 = vmatpush1.bf16.msra.mxu1 %v2265_v13 }
  0x1b   :  { %1929 = vmatprep.subr.bf16.mxu1 %v2277_v17  ;;  %502 = vperm.xlu1 %2059, %v497_v52  }
  0x1c   :  { %1831 = vmatmul.mubr.msk.f32.gmra.mrb[10].mxu0 %vm79_vm0, %v57_v36  ;;  %513 = vperm.xlu0 %2058, %v510_v51   ;;  %v327_v51 = vadd.s32 128, %v2494_v35 }
  0x1d   :  { %228 = vmatprep.mubr.f32.mxu0 %v3233_v5  ;;  %452 = vmatmul.mubr.f32.gmra.mrb[2].mxu1 %v3233_v5 }
  0x1e   :  { %1931 = vmatpush1.bf16.msra.mxu1 %v2294_v22  ;;  %622 = vmatprep.mubr.f32.mxu1 %v3233_v5 }
  0x1f   :  { %1933 = vmatprep.subr.bf16.mxu1 %v2302_v24 }
  0x20   :  { %1832 = vmatmul.mubr.msk.f32.gmra.mrb[12].mxu0 %vm79_vm0, %v58_v37  ;;  %516 = vperm.xlu0 %2058, %v511_v53  }
  0x21   :  { %234 = vmatprep.mubr.f32.mxu0 %v3233_v5 }
  0x22   :  { %1935 = vmatpush1.bf16.msra.mxu1 %v2319_v29 }
  0x23   :  { %1937 = vmatprep.subr.bf16.mxu1 %v2324_v30 }
  0x24   :  { %1833 = vmatmul.mubr.msk.f32.gmra.mrb[14].mxu0 %vm79_vm0, %v59_v38 }
  0x25   :  { %240 = vmatprep.mubr.f32.mxu0 %v3233_v5 }
  0x26   :  { %1939 = vmatpush1.bf16.msra.mxu1 %v2338_v34 }
  0x27   :  { %1941 = vmatprep.subr.bf16.mxu1 %v2263_v12 }
  0x28   :  { %1834 = vmatmul.mubr.msk.f32.gmra.mrb[16].mxu0 %vm79_vm0, %v60_v39 }
  0x29   :  { %246 = vmatprep.mubr.f32.mxu0 %v3233_v5 }
  0x2c   :  { %1835 = vmatmul.mubr.msk.f32.gmra.mrb[18].mxu0 %vm79_vm0, %v61_v40  ;;  %v332_v40 = vand.u32 63, %v2494_v35 }
  0x2d   :  { %252 = vmatprep.mubr.f32.mxu0 %v3233_v5 }
  0x2e   :  { %vm2507_vm6 = vcmp.lt.s32.totalorder %v332_v40, 32 }
  0x30   :  { %1836 = vmatmul.mubr.msk.f32.gmra.mrb[20].mxu0 %vm79_vm0, %v62_v41 }
  0x31   :  { %258 = vmatprep.mubr.f32.mxu0 %v3233_v5 }
  0x34   :  { %1837 = vmatmul.mubr.msk.f32.gmra.mrb[22].mxu0 %vm79_vm0, %v63_v42 }
  0x35   :  { %264 = vmatprep.mubr.f32.mxu0 %v3233_v5 }
  0x38   :  { %1838 = vmatmul.mubr.msk.f32.gmra.mrb[24].mxu0 %vm79_vm0, %v64_v43 }
  0x39   :  { %270 = vmatprep.mubr.f32.mxu0 %v3233_v5 }
  0x3c   :  { %1839 = vmatmul.mubr.msk.f32.gmra.mrb[26].mxu0 %vm79_vm0, %v65_v44 }
  0x3d   :  { %276 = vmatprep.mubr.f32.mxu0 %v3233_v5 }
  0x40   :  { %1840 = vmatmul.mubr.msk.f32.gmra.mrb[28].mxu0 %vm79_vm0, %v66_v45 }
  0x41   :  { %282 = vmatprep.mubr.f32.mxu0 %v3233_v5 }
  0x44   :  { %1841 = vmatmul.mubr.msk.f32.gmra.mrb[30].mxu0 %vm79_vm0, %v67_v46  ;;  %vm354_vm0 = vcmp.lt.s32.totalorder %v2494_v35, 32 }
  0x45   :  { %1163 = vmatprep.mubr.f32.mxu0 %v3233_v5 }
  0xdb   :  { %v194_v61 = vpop.f32.mrb[0].mxu0 }
  0xdc   :  { %v2457_v62 = vadd.f32 %v194_v61, %v2450_v59  ;;  %v196_v63 = vpop.f32.mrb[1].mxu0 }
  0xdd   :  { %v197_v0 = vadd.f32 %v196_v63, %v2454_v60 }
  0xde   :  { %3254 = vst [vmem:[#allocation8_spill] sm:$0xff] %v2457_v62 }
  0xdf   :  { %291 = vst.msk [vmem:[#allocation2 + $0x8] sm:$0xff] %vm290_vm5, %v197_v0  ;;  %v200_v1 = vpop.f32.mrb[2].mxu0  ;;  %v339_v0 = vand.u32 63, %v327_v51 }
  0xe0   :  { %v2462_v2 = vadd.f32 %v200_v1, %v2450_v59  ;;  %v202_v3 = vpop.f32.mrb[3].mxu0 }
  0xe1   :  { %v203_v4 = vadd.f32 %v202_v3, %v2454_v60  ;;  %vm2541_vm7 = vcmp.lt.s32.totalorder %v339_v0, 32 }
  0xe2   :  { %3255 = vst [vmem:[#allocation9_spill] sm:$0xff] %v2462_v2 }
  0xe3   :  { %293 = vst.msk [vmem:[#allocation2 + $0x18] sm:$0xff] %vm290_vm5, %v203_v4  ;;  %v206_v6 = vpop.f32.mrb[4].mxu0 }
  0xe4   :  { %v2467_v7 = vadd.f32 %v206_v6, %v2450_v59  ;;  %v208_v8 = vpop.f32.mrb[5].mxu0 }
  0xe5   :  { %v209_v9 = vadd.f32 %v208_v8, %v2454_v60 }
  0xe7   :  { %295 = vst.msk [vmem:[#allocation2 + $0x28] sm:$0xff] %vm290_vm5, %v209_v9  ;;  %v212_v10 = vpop.f32.mrb[6].mxu0 }
  0xe8   :  { %v2472_v11 = vadd.f32 %v212_v10, %v2450_v59  ;;  %v214_v14 = vpop.f32.mrb[7].mxu0  ;;  %v1710_v10 = vld [vmem:[%s3230_s6] sm:$0xff] }
  0xe9   :  { %v215_v15 = vadd.f32 %v214_v14, %v2454_v60 }
  0xeb   :  { %297 = vst.msk [vmem:[#allocation2 + $0x38] sm:$0xff] %vm290_vm5, %v215_v15  ;;  %v218_v16 = vpop.f32.mrb[8].mxu0 }
  0xec   :  { %v2477_v18 = vadd.f32 %v218_v16, %v2450_v59  ;;  %v220_v19 = vpop.f32.mrb[9].mxu0  ;;  %v2480_v21 = vpop.f32.mrb[0].mxu1 }
  0xed   :  { %v221_v20 = vadd.f32 %v220_v19, %v2454_v60  ;;  %v2482_v23 = vpop.f32.mrb[1].mxu1 }
  0xef   :  { %299 = vst.msk [vmem:[#allocation2 + $0x48] sm:$0xff] %vm290_vm5, %v221_v20  ;;  %v224_v25 = vpop.f32.mrb[10].mxu0 }
  0xf0   :  { %v2486_v26 = vadd.f32 %v224_v25, %v2450_v59  ;;  %v226_v27 = vpop.f32.mrb[11].mxu0  ;;  %v2489_v31 = vpop.f32.mrb[2].mxu1 }
  0xf1   :  { %v227_v28 = vadd.f32 %v226_v27, %v2454_v60  ;;  %v2491_v32 = vpop.f32.mrb[3].mxu1 }
  0xf3   :  { %301 = vst.msk [vmem:[#allocation2 + $0x58] sm:$0xff] %vm290_vm5, %v227_v28  ;;  %v230_v33 = vpop.f32.mrb[12].mxu0 }
  0xf4   :  { %v2497_v36 = vadd.f32 %v230_v33, %v2450_v59  ;;  %v232_v37 = vpop.f32.mrb[13].mxu0 }
  0xf5   :  { %v233_v38 = vadd.f32 %v232_v37, %v2454_v60 }
  0xf6   :  { %v2595_v0 = vld [vmem:[#allocation2 + $0x48] sm:$0xff] }
  0xf7   :  { %303 = vst.msk [vmem:[#allocation2 + $0x68] sm:$0xff] %vm290_vm5, %v233_v38  ;;  %v236_v39 = vpop.f32.mrb[14].mxu0 }
  0xf8   :  { %v2503_v41 = vadd.f32 %v236_v39, %v2450_v59  ;;  %v238_v42 = vpop.f32.mrb[15].mxu0 }
  0xf9   :  { %v239_v43 = vadd.f32 %v238_v42, %v2454_v60 }
  0xfb   :  { %305 = vst.msk [vmem:[#allocation2 + $0x78] sm:$0xff] %vm290_vm5, %v239_v43  ;;  %v242_v44 = vpop.f32.mrb[16].mxu0 }
  0xfc   :  { %v2512_v46 = vadd.f32 %v242_v44, %v2450_v59  ;;  %v244_v49 = vpop.f32.mrb[17].mxu0 }
  0xfd   :  { %v245_v52 = vadd.f32 %v244_v49, %v2454_v60 }
  0xfe   :  { %v2550_v16 = vld [vmem:[#allocation2 + $0x68] sm:$0xff] }
  0xff   :  { %307 = vst.msk [vmem:[#allocation2 + $0x88] sm:$0xff] %vm290_vm5, %v245_v52  ;;  %v248_v57 = vpop.f32.mrb[18].mxu0  ;;  %v1825_v52 = vld [vmem:[%s3229_s5 + $0x1] ss:$2 sm:$0x3]  ;;  %s2184_s5 = smov 64  }
 0x100   :  { %v2526_v61 = vadd.f32 %v248_v57, %v2450_v59  ;;  %v250_v63 = vpop.f32.mrb[19].mxu0 }
 0x101   :  { %v251_v1 = vadd.f32 %v250_v63, %v2454_v60 }
 0x102   :  { %v2571_v39 = vld [vmem:[#allocation2 + $0x78] sm:$0xff] }
 0x103   :  { %309 = vst.msk [vmem:[#allocation2 + $0x98] sm:$0xff] %vm290_vm5, %v251_v1  ;;  %v254_v6 = vpop.f32.mrb[20].mxu0 }
 0x104   :  { %v2539_v8 = vadd.f32 %v254_v6, %v2450_v59  ;;  %v256_v9 = vpop.f32.mrb[21].mxu0  ;;  %v2643_v6 = vld [vmem:[#allocation2 + $0x28] sm:$0xff] }
 0x105   :  { %v257_v14 = vadd.f32 %v256_v9, %v2454_v60 }
 0x106   :  { %v2552_v19 = vld [vmem:[#allocation2 + $0x88] sm:$0xff] }
 0x107   :  { %311 = vst.msk [vmem:[#allocation2 + $0xa8] sm:$0xff] %vm290_vm5, %v257_v14  ;;  %v260_v25 = vpop.f32.mrb[22].mxu0  ;;  %v2606_v14 = vrot.slane %v1825_v52, %v71_v56 }
 0x108   :  { %v2564_v28 = vadd.f32 %v260_v25, %v2450_v59  ;;  %v262_v33 = vpop.f32.mrb[23].mxu0 }
 0x109   :  { %v263_v37 = vadd.f32 %v262_v33, %v2454_v60 }
 0x10a   :  { %v2573_v40 = vld [vmem:[#allocation2 + $0x98] sm:$0xff] }
 0x10b   :  { %313 = vst.msk [vmem:[#allocation2 + $0xb8] sm:$0xff] %vm290_vm5, %v263_v37  ;;  %v266_v43 = vpop.f32.mrb[24].mxu0 }
 0x10c   :  { %v2585_v49 = vadd.f32 %v266_v43, %v2450_v59  ;;  %v268_v51 = vpop.f32.mrb[25].mxu0 }
 0x10d   :  { %v269_v57 = vadd.f32 %v268_v51, %v2454_v60 }
 0x10e   :  { %v2597_v1 = vld [vmem:[#allocation2 + $0xa8] sm:$0xff] }
 0x10f   :  { %315 = vst.msk [vmem:[#allocation2 + $0xc8] sm:$0xff] %vm290_vm5, %v269_v57  ;;  %v272_v9 = vpop.f32.mrb[26].mxu0  ;;  %v2620_v57 = vld [vmem:[#allocation2 + $0x58] sm:$0xff] }
 0x110   :  { %v2613_v33 = vadd.f32 %v272_v9, %v2450_v59  ;;  %v274_v37 = vpop.f32.mrb[27].mxu0 }
 0x111   :  { %v275_v43 = vadd.f32 %v274_v37, %v2454_v60  ;;  %v448_v37 = vadd.f32 %v2480_v21, %v2606_v14  ;;  %v2687_v21 = vld [vmem:[#allocation2 + $0x18] sm:$0xff] }
 0x112   :  { %v2622_v56 = vld [vmem:[#allocation2 + $0xb8] sm:$0xff]  ;;  %3264 = vst [vmem:[#allocation14_spill] sm:$0xff] %v2687_v21 }
 0x113   :  { %317 = vst.msk [vmem:[#allocation2 + $0xd8] sm:$0xff] %vm290_vm5, %v275_v43  ;;  %v278_v9 = vpop.f32.mrb[28].mxu0 }
 0x114   :  { %v2636_v42 = vadd.f32 %v278_v9, %v2450_v59  ;;  %v280_v20 = vpop.f32.mrb[29].mxu0 }
 0x115   :  { %v281_v44 = vadd.f32 %v280_v20, %v2454_v60  ;;  %v454_v20 = vadd.f32 %v2489_v31, %v2606_v14 }
 0x116   :  { %3260 = vst [vmem:[#allocation10_spill] sm:$0xff] %v2636_v42  ;;  %v363_v43 = vsel %vm2507_vm6, %v2457_v62, %v2636_v42  ;;  %v2645_v27 = vld [vmem:[#allocation2 + $0xc8] sm:$0xff] }
 0x117   :  { %319 = vst.msk [vmem:[#allocation2 + $0xe8] sm:$0xff] %vm290_vm5, %v281_v44  ;;  %v284_v9 = vpop.f32.mrb[30].mxu0  ;;  %v458_v25 = vadd.f32 %v448_v37, %v363_v43  ;;  %v2666_v37 = vld [vmem:[#allocation2 + $0x38] sm:$0xff] }
 0x118   :  { %v2659_v54 = vadd.f32 %v284_v9, %v2450_v59  ;;  %v286_v3 = vpop.f32.mrb[31].mxu0 }
 0x119   :  { %v287_v53 = vadd.f32 %v286_v3, %v2454_v60  ;;  %v1842_v38 = vmul.f32 -1.442695, %v458_v25  ;;  %v2679_v25 = vld [vmem:[#allocation2 + $0x8] sm:$0xff] }
 0x11a   :  { %3261 = vst [vmem:[#allocation11_spill] sm:$0xff] %v2659_v54  ;;  %v365_v44 = vsel %vm2507_vm6, %v2462_v2, %v2659_v54  ;;  %v2668_v31 = vld [vmem:[#allocation2 + $0xd8] sm:$0xff]  ;;  %3262 = vst [vmem:[#allocation12_spill] sm:$0xff] %v2679_v25 }
 0x11b   :  { %321 = vst.msk [vmem:[#allocation2 + $0xf8] sm:$0xff] %vm290_vm5, %v287_v53  ;;  %2060 = vpow2.f32 %v1842_v38  ;;  %v459_v59 = vadd.f32 %v454_v20, %v365_v44 }
 0x11d   :  { %v1843_v3 = vmul.f32 -1.442695, %v459_v59 }
 0x11e   :  { %v2681_v9 = vld [vmem:[#allocation2 + $0xe8] sm:$0xff] }
 0x11f   :  { %3263 = vst [vmem:[#allocation13_spill] sm:$0xff] %v2681_v9  ;;  %2062 = vpow2.f32 %v1843_v3  ;;  %v2697_v3 = vrot.slane %v1825_v52, %v75_v58  ;;  %v364_v38 = vsel %vm2541_vm7, %v2679_v25, %v2681_v9 }
 0x121   :  { %v450_v43 = vadd.f32 %v2482_v23, %v2697_v3  ;;  %v3298_v45 = vld [vmem:[#allocation12_spill] sm:$0xff] }
 0x122   :  { %v2689_v53 = vld [vmem:[#allocation2 + $0xf8] sm:$0xff] }
 0x123   :  { %3265 = vst [vmem:[#allocation15_spill] sm:$0xff] %v2689_v53  ;;  %v366_v55 = vsel %vm2541_vm7, %v2687_v21, %v2689_v53 }
 0x125   :  { %v2061_v20 = vpop.eup %2060 }
 0x126   :  { %v466_v44 = vadd.f32 1.0, %v2061_v20  ;;  %v456_v20 = vadd.f32 %v2491_v32, %v2697_v3  ;;  %v2715_v32 = vpop.permute.xlu1 %502 }
 0x127   :  { %3267 = vst [vmem:[#allocation17_spill] sm:$0xff] %v2715_v32  ;;  %vm3250_vm10 = vcmp.eq.s32.totalorder %v2715_v32, 1 }
 0x128   :  { %2064 = vrcp.f32 %v466_v44 }
 0x129   :  { %v2063_v59 = vpop.eup %2062 }
 0x12a   :  { %v467_v60 = vadd.f32 1.0, %v2063_v59 }
 0x12c   :  { %2066 = vrcp.f32 %v467_v60 }
 0x132   :  { %v2065_v4 = vpop.eup %2064 }
 0x133   :  { %v472_v15 = vmul.f32 %v2065_v4, %v450_v43  ;;  %v478_v43 = vsub.f32 1.0, %v2065_v4  ;;  %v490_v59 = vmul.f32 0.0, %v2065_v4 }
 0x135   :  { %v474_v51 = vadd.f32 %v472_v15, %v364_v38  ;;  %v2713_v15 = vpop.permute.xlu0 %499 }
 0x136   :  { %v2067_v44 = vpop.eup %2066  ;;  %3266 = vst [vmem:[#allocation16_spill] sm:$0xff] %v2713_v15  ;;  %vm3252_vm8 = vcmp.eq.s32.totalorder %v2713_v15, 1 }
 0x137   :  { %2068 = vtanh.f32 %v474_v51  ;;  %v473_v60 = vmul.f32 %v2067_v44, %v456_v20 }
 0x139   :  { %v475_v58 = vadd.f32 %v473_v60, %v366_v55  ;;  %v2717_v51 = vpop.permute.xlu0 %513  ;;  %v479_v60 = vsub.f32 1.0, %v2067_v44 }
 0x13a   :  { %3268 = vst [vmem:[#allocation18_spill] sm:$0xff] %v2717_v51  ;;  %vm3251_vm9 = vcmp.eq.s32.totalorder %v2717_v51, 1 }
 0x13b   :  { %2070 = vtanh.f32 %v475_v58 }
 0x13d   :  { %v2721_v58 = vpop.permute.xlu0 %516 }
 0x13e   :  { %3269 = vst [vmem:[#allocation19_spill] sm:$0xff] %v2721_v58  ;;  %vm3249_vm11 = vcmp.eq.s32.totalorder %v2721_v58, 1 }
 0x141   :  { %v2069_v23 = vpop.eup %2068 }
 0x142   :  { %482 = vrot.lane.b32.xlu1 %v2069_v23, %s2184_s5  ;;  %v491_v23 = vmul.f32 0.0, %v2067_v44 }
 0x145   :  { %v2071_v52 = vpop.eup %2070 }
 0x146   :  { %484 = vrot.lane.b32.xlu1 %v2071_v52, %s2184_s5 }
 0x1b4   :  { %v483_v38 = vpop.permute.xlu1 %482 }
 0x1b5   :  { %v488_v20 = vmul.f32 %v483_v38, %v478_v43 }
 0x1b7   :  { %v492_v63 = vadd.f32 %v490_v59, %v488_v20 }
 0x1b8   :  { %v485_v55 = vpop.permute.xlu1 %484 }
 0x1b9   :  { %v489_v52 = vmul.f32 %v485_v55, %v479_v60  ;;  %v520_v5 = vsel %vm3251_vm9, %v492_v63, 0.0  ;;  %v506_v48 = vsel %vm3252_vm8, %v492_v63, 0.0  ;;  %vm1058_vm9 = vcmp.gt.s32.totalorder %v2434_v50, 4 }
 0x1ba   :  { %532 = vrot.lane.b32.xlu1 %v520_v5, %s2184_s5  ;;  %524 = vrot.lane.b32.xlu0 %v506_v48, %s2184_s5  ;;  %v3270_v5 = vmov 0   ;;  %vm1044_vm8 = vcmp.gt.s32.totalorder %v2434_v50, 3 }
 0x1bb   :  { %v493_v4 = vadd.f32 %v491_v23, %v489_v52  ;;  %v693_v48 = vsel %vm691_vm12, 1, %v3270_v5  ;;  %v679_v63 = vsel %vm677_vm13, 1, %v3270_v5  ;;  %v694_v38 = vsel %vm692_vm14, 1, %v3270_v5 }
 0x1bc   :  { %v680_v59 = vsel %vm678_vm15, 1, %v3270_v5  ;;  %v3271_v23 = vmov 0.0   ;;  %vm874_vm12 = vcmp.gt.s32.totalorder %v2424_v47, 5  ;;  %vm860_vm13 = vcmp.gt.s32.totalorder %v2424_v47, 2 }
 0x1bd   :  { %v521_v44 = vsel %vm3249_vm11, %v493_v4, 0.0  ;;  %v507_v43 = vsel %vm3250_vm10, %v493_v4, 0.0  ;;  %vm875_vm14 = vcmp.gt.s32.totalorder %v2434_v50, 5  ;;  %vm861_vm15 = vcmp.gt.s32.totalorder %v2434_v50, 2 }
 0x1be   :  { %534 = vrot.lane.b32.xlu1 %v521_v44, %s2184_s5  ;;  %526 = vrot.lane.b32.xlu0 %v507_v43, %s2184_s5  ;;  %vm1057_vm11 = vcmp.gt.s32.totalorder %v2424_v47, 4  ;;  %vm1043_vm10 = vcmp.gt.s32.totalorder %v2424_v47, 3  ;;  %v1060_v47 = vsel %vm1058_vm9, 1, %v3270_v5 }
 0x1c2   :  { %696 = vperm.xlu1 %2059, %v693_v48   ;;  %682 = vperm.xlu0 %2058, %v679_v63  }
 0x1c6   :  { %699 = vperm.xlu1 %2059, %v694_v38   ;;  %685 = vperm.xlu0 %2058, %v680_v59   ;;  %v3272_v38 = vsel %vm2507_vm6, %v2467_v7, %v2585_v49 }
 0x22c   :  { %v525_v20 = vpop.permute.xlu0 %524  ;;  %v533_v60 = vpop.permute.xlu1 %532 }
 0x22d   :  { %v538_v55 = vsel %vm354_vm0, %v525_v20, %v533_v60 }
 0x22e   :  { %667 = vrot.lane.b32.xlu1 %v538_v55, %s2184_s5  ;;  %1844 = vmatmul.mubr.msk.f32.vlgmr.msra.gmra.mrb[4].mxu1 %vm290_vm5, %v538_v55 }
 0x22f   :  { %628 = vmatprep.mubr.f32.mxu1 %v3271_v23  ;;  %1943 = vmatpush1.bf16.msra.mxu1 %v2265_v13 }
 0x230   :  { %v527_v52 = vpop.permute.xlu0 %526  ;;  %v535_v4 = vpop.permute.xlu1 %534  ;;  %1945 = vmatprep.subr.bf16.mxu1 %v2277_v17 }
 0x231   :  { %v539_v44 = vsel %vm354_vm0, %v527_v52, %v535_v4  ;;  %v3273_v4 = vsel %vm2507_vm6, %v2472_v11, %v2613_v33 }
 0x232   :  { %669 = vrot.lane.b32.xlu1 %v539_v44, %s2184_s5  ;;  %1845 = vmatmul.mubr.msk.f32.gmra.mrb[6].mxu1 %vm290_vm5, %v539_v44 }
 0x233   :  { %1947 = vmatpush1.bf16.msra.mxu1 %v2294_v22  ;;  %805 = vmatprep.mubr.f32.mxu1 %v3271_v23 }
 0x234   :  { %1949 = vmatprep.subr.bf16.mxu1 %v2302_v24 }
 0x237   :  { %1951 = vmatpush1.bf16.msra.mxu1 %v2319_v29 }
 0x238   :  { %1953 = vmatprep.subr.bf16.mxu1 %v2324_v30 }
 0x23b   :  { %1955 = vmatpush1.bf16.msra.mxu1 %v2338_v34 }
 0x23c   :  { %1957 = vmatprep.subr.bf16.mxu1 %v2263_v12 }
 0x301   :  { %v624_v43 = vpop.f32.mrb[4].mxu1 }
 0x302   :  { %v625_v48 = vadd.f32 %v624_v43, %v2606_v14  ;;  %v626_v63 = vpop.f32.mrb[5].mxu1 }
 0x304   :  { %v635_v59 = vadd.f32 %v625_v48, %v3272_v38  ;;  %v627_v48 = vadd.f32 %v626_v63, %v2697_v3  ;;  %v2788_v63 = vpop.permute.xlu1 %696 }
 0x305   :  { %v630_v20 = vpop.f32.mrb[6].mxu1  ;;  %vm701_vm2 = vcmp.eq.s32.totalorder %v2788_v63, 1 }
 0x306   :  { %v1846_v60 = vmul.f32 -1.442695, %v635_v59  ;;  %v631_v55 = vadd.f32 %v630_v20, %v2606_v14  ;;  %v632_v52 = vpop.f32.mrb[7].mxu1  ;;  %v549_v20 = vsel %vm2541_vm7, %v2643_v6, %v2645_v27 }
 0x308   :  { %2072 = vpow2.f32 %v1846_v60  ;;  %v636_v44 = vadd.f32 %v631_v55, %v3273_v4  ;;  %v633_v55 = vadd.f32 %v632_v52, %v2697_v3  ;;  %v2792_v52 = vpop.permute.xlu1 %699 }
 0x309   :  { %vm702_vm4 = vcmp.eq.s32.totalorder %v2792_v52, 1 }
 0x30a   :  { %v1847_v43 = vmul.f32 -1.442695, %v636_v44 }
 0x30c   :  { %2074 = vpow2.f32 %v1847_v43  ;;  %v2790_v43 = vpop.permute.xlu0 %682 }
 0x30d   :  { %vm687_vm1 = vcmp.eq.s32.totalorder %v2790_v43, 1 }
 0x312   :  { %v2073_v58 = vpop.eup %2072 }
 0x313   :  { %v643_v32 = vadd.f32 1.0, %v2073_v58 }
 0x315   :  { %2076 = vrcp.f32 %v643_v32 }
 0x316   :  { %v2075_v51 = vpop.eup %2074 }
 0x317   :  { %v644_v15 = vadd.f32 1.0, %v2075_v51 }
 0x319   :  { %2078 = vrcp.f32 %v644_v15  ;;  %v551_v15 = vsel %vm2541_vm7, %v2666_v37, %v2668_v31 }
 0x31f   :  { %v2077_v38 = vpop.eup %2076 }
 0x320   :  { %v649_v59 = vmul.f32 %v2077_v38, %v627_v48  ;;  %v2794_v48 = vpop.permute.xlu0 %685 }
 0x321   :  { %vm688_vm3 = vcmp.eq.s32.totalorder %v2794_v48, 1 }
 0x322   :  { %v651_v60 = vadd.f32 %v649_v59, %v549_v20  ;;  %v668_v59 = vpop.permute.xlu1 %667  ;;  %v655_v20 = vsub.f32 1.0, %v2077_v38 }
 0x323   :  { %v2079_v4 = vpop.eup %2078 }
 0x324   :  { %2080 = vtanh.f32 %v651_v60  ;;  %v650_v44 = vmul.f32 %v2079_v4, %v633_v55 }
 0x326   :  { %v652_v32 = vadd.f32 %v650_v44, %v551_v15  ;;  %v673_v44 = vmul.f32 %v2077_v38, %v668_v59 }
 0x328   :  { %2082 = vtanh.f32 %v652_v32  ;;  %v656_v32 = vsub.f32 1.0, %v2079_v4 }
 0x32e   :  { %v2081_v51 = vpop.eup %2080 }
 0x32f   :  { %659 = vrot.lane.b32.xlu0 %v2081_v51, %s2184_s5  ;;  %v670_v51 = vpop.permute.xlu1 %669 }
 0x330   :  { %v674_v53 = vmul.f32 %v2079_v4, %v670_v51 }
 0x332   :  { %v2083_v58 = vpop.eup %2082 }
 0x333   :  { %661 = vrot.lane.b32.xlu0 %v2083_v58, %s2184_s5 }
 0x3a1   :  { %v660_v60 = vpop.permute.xlu0 %659 }
 0x3a2   :  { %v665_v55 = vmul.f32 %v660_v60, %v655_v20 }
 0x3a4   :  { %v675_v15 = vadd.f32 %v673_v44, %v665_v55 }
 0x3a5   :  { %v662_v58 = vpop.permute.xlu0 %661 }
 0x3a6   :  { %v666_v21 = vmul.f32 %v662_v58, %v656_v32  ;;  %v703_v25 = vsel %vm701_vm2, %v675_v15, %v668_v59  ;;  %v689_v9 = vsel %vm687_vm1, %v675_v15, %v668_v59 }
 0x3a7   :  { %715 = vrot.lane.b32.xlu1 %v703_v25, %s2184_s5  ;;  %707 = vrot.lane.b32.xlu0 %v689_v9, %s2184_s5  ;;  %v862_v25 = vsel %vm860_vm13, 1, %v3270_v5  ;;  %v877_v9 = vsel %vm875_vm14, 1, %v3270_v5 }
 0x3a8   :  { %v676_v38 = vadd.f32 %v674_v53, %v666_v21  ;;  %v876_v21 = vsel %vm874_vm12, 1, %v3270_v5  ;;  %v863_v53 = vsel %vm861_vm15, 1, %v3270_v5 }
 0x3aa   :  { %v704_v4 = vsel %vm702_vm4, %v676_v38, %v670_v51  ;;  %v690_v20 = vsel %vm688_vm3, %v676_v38, %v670_v51 }
 0x3ab   :  { %717 = vrot.lane.b32.xlu1 %v704_v4, %s2184_s5  ;;  %709 = vrot.lane.b32.xlu0 %v690_v20, %s2184_s5  ;;  %v3274_v4 = vsel %vm2507_vm6, %v2477_v18, %v2539_v8 }
 0x3af   :  { %879 = vperm.xlu1 %2059, %v876_v21   ;;  %865 = vperm.xlu0 %2058, %v862_v25  }
 0x3b3   :  { %882 = vperm.xlu1 %2059, %v877_v9   ;;  %868 = vperm.xlu0 %2058, %v863_v53  }
 0x419   :  { %v708_v59 = vpop.permute.xlu0 %707  ;;  %v716_v60 = vpop.permute.xlu1 %715 }
 0x41a   :  { %v721_v55 = vsel %vm354_vm0, %v708_v59, %v716_v60  ;;  %v3275_v59 = vsel %vm2507_vm6, %v2486_v26, %v2564_v28 }
 0x41b   :  { %850 = vrot.lane.b32.xlu1 %v721_v55, %s2184_s5  ;;  %1848 = vmatmul.mubr.msk.f32.vlgmr.msra.gmra.mrb[8].mxu1 %vm290_vm5, %v721_v55 }
 0x41c   :  { %811 = vmatprep.mubr.f32.mxu1 %v3271_v23  ;;  %1959 = vmatpush1.bf16.msra.mxu1 %v2265_v13 }
 0x41d   :  { %v710_v44 = vpop.permute.xlu0 %709  ;;  %v718_v15 = vpop.permute.xlu1 %717  ;;  %1961 = vmatprep.subr.bf16.mxu1 %v2277_v17 }
 0x41e   :  { %v722_v32 = vsel %vm354_vm0, %v710_v44, %v718_v15 }
 0x41f   :  { %852 = vrot.lane.b32.xlu1 %v722_v32, %s2184_s5  ;;  %1849 = vmatmul.mubr.msk.f32.gmra.mrb[10].mxu1 %vm290_vm5, %v722_v32 }
 0x420   :  { %1963 = vmatpush1.bf16.msra.mxu1 %v2294_v22  ;;  %988 = vmatprep.mubr.f32.mxu1 %v3271_v23 }
 0x421   :  { %1965 = vmatprep.subr.bf16.mxu1 %v2302_v24 }
 0x424   :  { %1967 = vmatpush1.bf16.msra.mxu1 %v2319_v29 }
 0x425   :  { %1969 = vmatprep.subr.bf16.mxu1 %v2324_v30 }
 0x428   :  { %1971 = vmatpush1.bf16.msra.mxu1 %v2338_v34 }
 0x429   :  { %1989 = vmatprep.subr.bf16.mxu1 %v2263_v12 }
 0x4ee   :  { %v807_v51 = vpop.f32.mrb[8].mxu1 }
 0x4ef   :  { %v808_v58 = vadd.f32 %v807_v51, %v2606_v14  ;;  %v809_v38 = vpop.f32.mrb[9].mxu1 }
 0x4f1   :  { %v818_v20 = vadd.f32 %v808_v58, %v3274_v4  ;;  %v810_v58 = vadd.f32 %v809_v38, %v2697_v3 }
 0x4f2   :  { %v813_v21 = vpop.f32.mrb[10].mxu1 }
 0x4f3   :  { %v1850_v25 = vmul.f32 -1.442695, %v818_v20  ;;  %v814_v9 = vadd.f32 %v813_v21, %v2606_v14  ;;  %v815_v53 = vpop.f32.mrb[11].mxu1  ;;  %v732_v21 = vsel %vm2541_vm7, %v2595_v0, %v2597_v1 }
 0x4f5   :  { %2084 = vpow2.f32 %v1850_v25  ;;  %v819_v60 = vadd.f32 %v814_v9, %v3275_v59  ;;  %v816_v9 = vadd.f32 %v815_v53, %v2697_v3 }
 0x4f7   :  { %v1851_v55 = vmul.f32 -1.442695, %v819_v60 }
 0x4f9   :  { %2086 = vpow2.f32 %v1851_v55  ;;  %v734_v55 = vsel %vm2541_vm7, %v2620_v57, %v2622_v56 }
 0x4ff   :  { %v2085_v44 = vpop.eup %2084 }
 0x500   :  { %v826_v15 = vadd.f32 1.0, %v2085_v44 }
 0x502   :  { %2088 = vrcp.f32 %v826_v15 }
 0x503   :  { %v2087_v32 = vpop.eup %2086 }
 0x504   :  { %v827_v51 = vadd.f32 1.0, %v2087_v32  ;;  %v2862_v32 = vpop.permute.xlu1 %879 }
 0x505   :  { %vm884_vm13 = vcmp.eq.s32.totalorder %v2862_v32, 1 }
 0x506   :  { %2090 = vrcp.f32 %v827_v51  ;;  %v2864_v51 = vpop.permute.xlu0 %865 }
 0x507   :  { %vm870_vm12 = vcmp.eq.s32.totalorder %v2864_v51, 1 }
 0x508   :  { %v2866_v53 = vpop.permute.xlu1 %882 }
 0x509   :  { %vm885_vm15 = vcmp.eq.s32.totalorder %v2866_v53, 1 }
 0x50c   :  { %v2089_v4 = vpop.eup %2088 }
 0x50d   :  { %v832_v20 = vmul.f32 %v2089_v4, %v810_v58  ;;  %v2868_v58 = vpop.permute.xlu0 %868 }
 0x50e   :  { %vm871_vm14 = vcmp.eq.s32.totalorder %v2868_v58, 1 }
 0x50f   :  { %v834_v25 = vadd.f32 %v832_v20, %v732_v21  ;;  %v851_v20 = vpop.permute.xlu1 %850  ;;  %v838_v21 = vsub.f32 1.0, %v2089_v4 }
 0x510   :  { %v2091_v59 = vpop.eup %2090 }
 0x511   :  { %2092 = vtanh.f32 %v834_v25  ;;  %v833_v60 = vmul.f32 %v2091_v59, %v816_v9 }
 0x513   :  { %v835_v44 = vadd.f32 %v833_v60, %v734_v55  ;;  %v856_v60 = vmul.f32 %v2089_v4, %v851_v20 }
 0x515   :  { %2094 = vtanh.f32 %v835_v44  ;;  %v839_v44 = vsub.f32 1.0, %v2091_v59 }
 0x51b   :  { %v2093_v38 = vpop.eup %2092 }
 0x51c   :  { %842 = vrot.lane.b32.xlu0 %v2093_v38, %s2184_s5  ;;  %v853_v38 = vpop.permute.xlu1 %852 }
 0x51d   :  { %v857_v54 = vmul.f32 %v2091_v59, %v853_v38 }
 0x51f   :  { %v2095_v15 = vpop.eup %2094 }
 0x520   :  { %844 = vrot.lane.b32.xlu0 %v2095_v15, %s2184_s5 }
 0x58e   :  { %v843_v25 = vpop.permute.xlu0 %842 }
 0x58f   :  { %v848_v9 = vmul.f32 %v843_v25, %v838_v21 }
 0x591   :  { %v858_v55 = vadd.f32 %v856_v60, %v848_v9 }
 0x592   :  { %v845_v15 = vpop.permute.xlu0 %844 }
 0x593   :  { %v849_v2 = vmul.f32 %v845_v15, %v839_v44  ;;  %v886_v62 = vsel %vm884_vm13, %v858_v55, %v851_v20  ;;  %v872_v42 = vsel %vm870_vm12, %v858_v55, %v851_v20  ;;  %v3276_v15 = vsel %vm2507_vm6, %v2497_v36, %v2512_v46 }
 0x594   :  { %898 = vrot.lane.b32.xlu1 %v886_v62, %s2184_s5  ;;  %890 = vrot.lane.b32.xlu0 %v872_v42, %s2184_s5  ;;  %v1059_v62 = vsel %vm1057_vm11, 1, %v3270_v5 }
 0x595   :  { %v859_v4 = vadd.f32 %v857_v54, %v849_v2  ;;  %v1045_v2 = vsel %vm1043_vm10, 1, %v3270_v5  ;;  %v1046_v54 = vsel %vm1044_vm8, 1, %v3270_v5 }
 0x597   :  { %v887_v59 = vsel %vm885_vm15, %v859_v4, %v853_v38  ;;  %v873_v21 = vsel %vm871_vm14, %v859_v4, %v853_v38 }
 0x598   :  { %900 = vrot.lane.b32.xlu1 %v887_v59, %s2184_s5  ;;  %892 = vrot.lane.b32.xlu0 %v873_v21, %s2184_s5 }
 0x59c   :  { %1062 = vperm.xlu1 %2059, %v1059_v62   ;;  %1048 = vperm.xlu0 %2058, %v1045_v2  }
 0x5a0   :  { %1065 = vperm.xlu1 %2059, %v1060_v47   ;;  %1051 = vperm.xlu0 %2058, %v1046_v54  }
 0x606   :  { %v891_v42 = vpop.permute.xlu0 %890  ;;  %v899_v20 = vpop.permute.xlu1 %898 }
 0x607   :  { %v904_v25 = vsel %vm354_vm0, %v891_v42, %v899_v20 }
 0x608   :  { %1033 = vrot.lane.b32.xlu1 %v904_v25, %s2184_s5  ;;  %1852 = vmatmul.mubr.msk.f32.vlgmr.msra.gmra.mrb[12].mxu1 %vm290_vm5, %v904_v25 }
 0x609   :  { %994 = vmatprep.mubr.f32.mxu1 %v3271_v23  ;;  %1991 = vmatpush1.bf16.msra.mxu1 %v2265_v13 }
 0x60a   :  { %v893_v50 = vpop.permute.xlu0 %892  ;;  %v901_v9 = vpop.permute.xlu1 %900  ;;  %1993 = vmatprep.subr.bf16.mxu1 %v2277_v17 }
 0x60b   :  { %v905_v60 = vsel %vm354_vm0, %v893_v50, %v901_v9 }
 0x60c   :  { %1035 = vrot.lane.b32.xlu1 %v905_v60, %s2184_s5  ;;  %1853 = vmatmul.mubr.msk.f32.gmra.mrb[14].mxu1 %vm290_vm5, %v905_v60 }
 0x60d   :  { %1995 = vmatpush1.bf16.msra.mxu1 %v2294_v22  ;;  %1314 = vmatprep.mubr.f32.mxu1 %v3271_v23 }
 0x60e   :  { %1997 = vmatprep.subr.bf16.mxu1 %v2302_v24 }
 0x611   :  { %1999 = vmatpush1.bf16.msra.mxu1 %v2319_v29 }
 0x612   :  { %2001 = vmatprep.subr.bf16.mxu1 %v2324_v30 }
 0x615   :  { %2003 = vmatpush1.bf16.msra.mxu1 %v2338_v34 }
 0x616   :  { %2021 = vmatprep.subr.bf16.mxu1 %v2263_v12  ;;  %v3277_v12 = vsel %vm2507_vm6, %v2503_v41, %v2526_v61 }
 0x6db   :  { %v990_v55 = vpop.f32.mrb[12].mxu1 }
 0x6dc   :  { %v991_v44 = vadd.f32 %v990_v55, %v2606_v14  ;;  %v992_v38 = vpop.f32.mrb[13].mxu1 }
 0x6dd   :  { %v993_v9 = vadd.f32 %v992_v38, %v2697_v3 }
 0x6de   :  { %v1001_v4 = vadd.f32 %v991_v44, %v3276_v15  ;;  %v915_v44 = vsel %vm2541_vm7, %v2550_v16, %v2552_v19 }
 0x6df   :  { %v996_v59 = vpop.f32.mrb[14].mxu1 }
 0x6e0   :  { %v1854_v21 = vmul.f32 -1.442695, %v1001_v4  ;;  %v997_v62 = vadd.f32 %v996_v59, %v2606_v14  ;;  %v998_v2 = vpop.f32.mrb[15].mxu1 }
 0x6e1   :  { %v999_v4 = vadd.f32 %v998_v2, %v2697_v3 }
 0x6e2   :  { %2096 = vpow2.f32 %v1854_v21  ;;  %v1002_v47 = vadd.f32 %v997_v62, %v3277_v12  ;;  %v917_v62 = vsel %vm2541_vm7, %v2571_v39, %v2573_v40 }
 0x6e4   :  { %v1855_v54 = vmul.f32 -1.442695, %v1002_v47 }
 0x6e6   :  { %2098 = vpow2.f32 %v1855_v54  ;;  %v2936_v54 = vpop.permute.xlu1 %1062 }
 0x6e7   :  { %vm1067_vm9 = vcmp.eq.s32.totalorder %v2936_v54, 1 }
 0x6ea   :  { %v2940_v2 = vpop.permute.xlu1 %1065 }
 0x6eb   :  { %vm1068_vm11 = vcmp.eq.s32.totalorder %v2940_v2, 1 }
 0x6ec   :  { %v2097_v42 = vpop.eup %2096 }
 0x6ed   :  { %v1009_v20 = vadd.f32 1.0, %v2097_v42  ;;  %v2938_v42 = vpop.permute.xlu0 %1048 }
 0x6ee   :  { %vm1053_vm8 = vcmp.eq.s32.totalorder %v2938_v42, 1 }
 0x6ef   :  { %2100 = vrcp.f32 %v1009_v20 }
 0x6f0   :  { %v2099_v25 = vpop.eup %2098 }
 0x6f1   :  { %v1010_v50 = vadd.f32 1.0, %v2099_v25  ;;  %v2942_v20 = vpop.permute.xlu0 %1051  ;;  %v1034_v25 = vpop.permute.xlu1 %1033 }
 0x6f2   :  { %vm1054_vm10 = vcmp.eq.s32.totalorder %v2942_v20, 1 }
 0x6f3   :  { %2102 = vrcp.f32 %v1010_v50 }
 0x6f9   :  { %v2101_v60 = vpop.eup %2100 }
 0x6fa   :  { %v1015_v55 = vmul.f32 %v2101_v60, %v993_v9  ;;  %v1021_v50 = vsub.f32 1.0, %v2101_v60 }
 0x6fc   :  { %v1017_v15 = vadd.f32 %v1015_v55, %v915_v44  ;;  %v1039_v44 = vmul.f32 %v2101_v60, %v1034_v25 }
 0x6fd   :  { %v2103_v59 = vpop.eup %2102 }
 0x6fe   :  { %2104 = vtanh.f32 %v1017_v15  ;;  %v1016_v21 = vmul.f32 %v2103_v59, %v999_v4  ;;  %v1022_v4 = vsub.f32 1.0, %v2103_v59 }
 0x700   :  { %v1018_v12 = vadd.f32 %v1016_v21, %v917_v62  ;;  %v1036_v21 = vpop.permute.xlu1 %1035 }
 0x702   :  { %2106 = vtanh.f32 %v1018_v12 }
 0x708   :  { %v2105_v38 = vpop.eup %2104 }
 0x709   :  { %1025 = vrot.lane.b32.xlu0 %v2105_v38, %s2184_s5  ;;  %v1040_v38 = vmul.f32 %v2103_v59, %v1036_v21 }
 0x70c   :  { %v2107_v47 = vpop.eup %2106 }
 0x70d   :  { %1027 = vrot.lane.b32.xlu0 %v2107_v47, %s2184_s5 }
 0x77b   :  { %v1026_v9 = vpop.permute.xlu0 %1025 }
 0x77c   :  { %v1031_v55 = vmul.f32 %v1026_v9, %v1021_v50 }
 0x77e   :  { %v1041_v15 = vadd.f32 %v1039_v44, %v1031_v55 }
 0x77f   :  { %v1028_v62 = vpop.permute.xlu0 %1027 }
 0x780   :  { %v1032_v12 = vmul.f32 %v1028_v62, %v1022_v4  ;;  %v1069_v47 = vsel %vm1067_vm9, %v1041_v15, %v1034_v25  ;;  %v1055_v5 = vsel %vm1053_vm8, %v1041_v15, %v1034_v25 }
 0x781   :  { %1081 = vrot.lane.b32.xlu1 %v1069_v47, %s2184_s5  ;;  %1073 = vrot.lane.b32.xlu0 %v1055_v5, %s2184_s5 }
 0x782   :  { %v1042_v60 = vadd.f32 %v1040_v38, %v1032_v12  ;;  %v3278_v12 = vsel %vm2507_vm6, %v2512_v46, %v2497_v36 }
 0x784   :  { %v1070_v50 = vsel %vm1068_vm11, %v1042_v60, %v1036_v21  ;;  %v1056_v59 = vsel %vm1054_vm10, %v1042_v60, %v1036_v21 }
 0x785   :  { %1083 = vrot.lane.b32.xlu1 %v1070_v50, %s2184_s5  ;;  %1075 = vrot.lane.b32.xlu0 %v1056_v59, %s2184_s5 }
 0x7f3   :  { %v1074_v25 = vpop.permute.xlu0 %1073  ;;  %v1082_v9 = vpop.permute.xlu1 %1081 }
 0x7f4   :  { %v1087_v5 = vsel %vm354_vm0, %v1074_v25, %v1082_v9  ;;  %v3279_v25 = vsel %vm2507_vm6, %v2526_v61, %v2503_v41 }
 0x7f5   :  { %1208 = vrot.lane.b32.xlu1 %v1087_v5, %s2184_s5  ;;  %1856 = vmatmul.mubr.msk.f32.vlgmr.msra.gmra.mrb[32].mxu0 %vm290_vm5, %v1087_v5 }
 0x7f6   :  { %1169 = vmatprep.mubr.f32.mxu0 %v3271_v23  ;;  %2007 = vmatpush1.bf16.msra.mxu0 %v2265_v13 }
 0x7f7   :  { %v1076_v55 = vpop.permute.xlu0 %1075  ;;  %v1084_v44 = vpop.permute.xlu1 %1083  ;;  %2009 = vmatprep.subr.bf16.mxu0 %v2277_v17 }
 0x7f8   :  { %v1088_v15 = vsel %vm354_vm0, %v1076_v55, %v1084_v44 }
 0x7f9   :  { %1210 = vrot.lane.b32.xlu1 %v1088_v15, %s2184_s5  ;;  %1857 = vmatmul.mubr.msk.f32.gmra.mrb[34].mxu0 %vm290_vm5, %v1088_v15 }
 0x7fa   :  { %2011 = vmatpush1.bf16.msra.mxu0 %v2294_v22  ;;  %1465 = vmatprep.mubr.f32.mxu0 %v3271_v23 }
 0x7fb   :  { %2013 = vmatprep.subr.bf16.mxu0 %v2302_v24 }
 0x7fe   :  { %2015 = vmatpush1.bf16.msra.mxu0 %v2319_v29 }
 0x7ff   :  { %2017 = vmatprep.subr.bf16.mxu0 %v2324_v30 }
 0x802   :  { %2019 = vmatpush1.bf16.msra.mxu0 %v2338_v34 }
 0x8c8   :  { %v1165_v4 = vpop.f32.mrb[32].mxu0 }
 0x8c9   :  { %v1166_v21 = vadd.f32 %v1165_v4, %v2606_v14  ;;  %v1167_v62 = vpop.f32.mrb[33].mxu0 }
 0x8ca   :  { %v1168_v46 = vadd.f32 %v1167_v62, %v2697_v3 }
 0x8cb   :  { %v1176_v38 = vadd.f32 %v1166_v21, %v3278_v12  ;;  %v3280_v12 = vsel %vm2541_vm7, %v2552_v19, %v2550_v16  ;;  %v1209_v16 = vpop.permute.xlu1 %1208 }
 0x8cc   :  { %v1171_v47 = vpop.f32.mrb[34].mxu0 }
 0x8cd   :  { %v1858_v60 = vmul.f32 -1.442695, %v1176_v38  ;;  %v1172_v50 = vadd.f32 %v1171_v47, %v2606_v14  ;;  %v1173_v59 = vpop.f32.mrb[35].mxu0 }
 0x8ce   :  { %v1174_v41 = vadd.f32 %v1173_v59, %v2697_v3 }
 0x8cf   :  { %2108 = vpow2.f32 %v1858_v60  ;;  %v1177_v9 = vadd.f32 %v1172_v50, %v3279_v25  ;;  %v3281_v60 = vsel %vm2541_vm7, %v2573_v40, %v2571_v39 }
 0x8d1   :  { %v1859_v5 = vmul.f32 -1.442695, %v1177_v9 }
 0x8d3   :  { %2110 = vpow2.f32 %v1859_v5 }
 0x8d9   :  { %v2109_v55 = vpop.eup %2108 }
 0x8da   :  { %v1184_v44 = vadd.f32 1.0, %v2109_v55 }
 0x8dc   :  { %2112 = vrcp.f32 %v1184_v44 }
 0x8dd   :  { %v2111_v15 = vpop.eup %2110 }
 0x8de   :  { %v1185_v36 = vadd.f32 1.0, %v2111_v15  ;;  %v1211_v15 = vpop.permute.xlu1 %1210 }
 0x8e0   :  { %2114 = vrcp.f32 %v1185_v36 }
 0x8e6   :  { %v2113_v4 = vpop.eup %2112 }
 0x8e7   :  { %v1190_v21 = vmul.f32 %v2113_v4, %v1168_v46  ;;  %v1196_v19 = vsub.f32 1.0, %v2113_v4  ;;  %v1214_v5 = vmul.f32 %v2113_v4, %v1209_v16 }
 0x8e9   :  { %v1192_v38 = vadd.f32 %v1190_v21, %v3280_v12 }
 0x8ea   :  { %v2115_v61 = vpop.eup %2114 }
 0x8eb   :  { %2116 = vtanh.f32 %v1192_v38  ;;  %v1191_v47 = vmul.f32 %v2115_v61, %v1174_v41  ;;  %v1197_v44 = vsub.f32 1.0, %v2115_v61  ;;  %v1215_v21 = vmul.f32 %v2115_v61, %v1211_v15 }
 0x8ed   :  { %v1193_v50 = vadd.f32 %v1191_v47, %v3281_v60  ;;  %v3282_v60 = vsel %vm2507_vm6, %v2539_v8, %v2477_v18 }
 0x8ef   :  { %2118 = vtanh.f32 %v1193_v50 }
 0x8f5   :  { %v2117_v62 = vpop.eup %2116 }
 0x8f6   :  { %1200 = vrot.lane.b32.xlu0 %v2117_v62, %s2184_s5 }
 0x8f9   :  { %v2119_v25 = vpop.eup %2118 }
 0x8fa   :  { %1202 = vrot.lane.b32.xlu0 %v2119_v25, %s2184_s5 }
 0x968   :  { %v1201_v9 = vpop.permute.xlu0 %1200 }
 0x969   :  { %v1206_v59 = vmul.f32 %v1201_v9, %v1196_v19 }
 0x96b   :  { %v1216_v55 = vadd.f32 %v1214_v5, %v1206_v59 }
 0x96c   :  { %v1203_v36 = vpop.permute.xlu0 %1202 }
 0x96d   :  { %v1207_v46 = vmul.f32 %v1203_v36, %v1197_v44  ;;  %v1220_v39 = vsel %vm1053_vm8, %v1216_v55, %v1209_v16  ;;  %v1218_v40 = vsel %vm1067_vm9, %v1216_v55, %v1209_v16  ;;  %v3284_v55 = vsel %vm2541_vm7, %v2597_v1, %v2595_v0 }
 0x96e   :  { %1232 = vrot.lane.b32.xlu1 %v1220_v39, %s2184_s5  ;;  %1224 = vrot.lane.b32.xlu0 %v1218_v40, %s2184_s5  ;;  %v3285_v36 = vsel %vm2541_vm7, %v2622_v56, %v2620_v57 }
 0x96f   :  { %v1217_v12 = vadd.f32 %v1215_v21, %v1207_v46 }
 0x971   :  { %v1221_v4 = vsel %vm1054_vm10, %v1217_v12, %v1211_v15  ;;  %v1219_v38 = vsel %vm1068_vm11, %v1217_v12, %v1211_v15 }
 0x972   :  { %1234 = vrot.lane.b32.xlu1 %v1221_v4, %s2184_s5  ;;  %1226 = vrot.lane.b32.xlu0 %v1219_v38, %s2184_s5 }
 0x9e0   :  { %v1225_v42 = vpop.permute.xlu0 %1224  ;;  %v1233_v41 = vpop.permute.xlu1 %1232 }
 0x9e1   :  { %v1238_v54 = vsel %vm354_vm0, %v1225_v42, %v1233_v41 }
 0x9e2   :  { %1359 = vrot.lane.b32.xlu1 %v1238_v54, %s2184_s5  ;;  %1860 = vmatmul.mubr.msk.f32.vlgmr.msra.gmra.mrb[16].mxu1 %vm290_vm5, %v1238_v54 }
 0x9e3   :  { %1320 = vmatprep.mubr.f32.mxu1 %v3271_v23  ;;  %2023 = vmatpush1.bf16.msra.mxu1 %v2265_v13 }
 0x9e4   :  { %v1227_v20 = vpop.permute.xlu0 %1226  ;;  %v1235_v2 = vpop.permute.xlu1 %1234  ;;  %2025 = vmatprep.subr.bf16.mxu1 %v2277_v17 }
 0x9e5   :  { %v1239_v61 = vsel %vm354_vm0, %v1227_v20, %v1235_v2 }
 0x9e6   :  { %1361 = vrot.lane.b32.xlu1 %v1239_v61, %s2184_s5  ;;  %1861 = vmatmul.mubr.msk.f32.gmra.mrb[18].mxu1 %vm290_vm5, %v1239_v61 }
 0x9e7   :  { %2027 = vmatpush1.bf16.msra.mxu1 %v2294_v22  ;;  %1616 = vmatprep.mubr.f32.mxu1 %v3271_v23 }
 0x9e8   :  { %2029 = vmatprep.subr.bf16.mxu1 %v2302_v24 }
 0x9eb   :  { %2031 = vmatpush1.bf16.msra.mxu1 %v2319_v29  ;;  %v3283_v29 = vsel %vm2507_vm6, %v2564_v28, %v2486_v26 }
 0x9ec   :  { %2033 = vmatprep.subr.bf16.mxu1 %v2324_v30 }
 0x9ef   :  { %2035 = vmatpush1.bf16.msra.mxu1 %v2338_v34 }
 0xa54   :  { %v1360_v0 = vpop.permute.xlu1 %1359 }
 0xa58   :  { %v1362_v41 = vpop.permute.xlu1 %1361 }
 0xab5   :  { %v1316_v13 = vpop.f32.mrb[16].mxu1 }
 0xab6   :  { %v1317_v17 = vadd.f32 %v1316_v13, %v2606_v14  ;;  %v1318_v47 = vpop.f32.mrb[17].mxu1 }
 0xab7   :  { %v1319_v8 = vadd.f32 %v1318_v47, %v2697_v3 }
 0xab8   :  { %v1327_v22 = vadd.f32 %v1317_v17, %v3282_v60 }
 0xab9   :  { %v1322_v50 = vpop.f32.mrb[18].mxu1 }
 0xaba   :  { %v1862_v62 = vmul.f32 -1.442695, %v1327_v22  ;;  %v1323_v24 = vadd.f32 %v1322_v50, %v2606_v14  ;;  %v1324_v25 = vpop.f32.mrb[19].mxu1 }
 0xabb   :  { %v1325_v26 = vadd.f32 %v1324_v25, %v2697_v3 }
 0xabc   :  { %2120 = vpow2.f32 %v1862_v62  ;;  %v1328_v30 = vadd.f32 %v1323_v24, %v3283_v29  ;;  %v3286_v24 = vsel %vm2507_vm6, %v2585_v49, %v2467_v7 }
 0xabe   :  { %v1863_v34 = vmul.f32 -1.442695, %v1328_v30 }
 0xac0   :  { %2122 = vpow2.f32 %v1863_v34 }
 0xac6   :  { %v2121_v16 = vpop.eup %2120 }
 0xac7   :  { %v1335_v19 = vadd.f32 1.0, %v2121_v16 }
 0xac9   :  { %2124 = vrcp.f32 %v1335_v19  ;;  %v3287_v19 = vsel %vm2507_vm6, %v2613_v33, %v2472_v11 }
 0xaca   :  { %v2123_v9 = vpop.eup %2122 }
 0xacb   :  { %v1336_v18 = vadd.f32 1.0, %v2123_v9 }
 0xacd   :  { %2126 = vrcp.f32 %v1336_v18 }
 0xad3   :  { %v2125_v59 = vpop.eup %2124 }
 0xad4   :  { %v1341_v5 = vmul.f32 %v2125_v59, %v1319_v8  ;;  %v1347_v1 = vsub.f32 1.0, %v2125_v59  ;;  %v1365_v4 = vmul.f32 %v2125_v59, %v1360_v0 }
 0xad6   :  { %v1343_v44 = vadd.f32 %v1341_v5, %v3284_v55 }
 0xad7   :  { %v2127_v28 = vpop.eup %2126 }
 0xad8   :  { %2128 = vtanh.f32 %v1343_v44  ;;  %v1342_v15 = vmul.f32 %v2127_v28, %v1325_v26  ;;  %v1348_v42 = vsub.f32 1.0, %v2127_v28  ;;  %v1366_v2 = vmul.f32 %v2127_v28, %v1362_v41 }
 0xad9   :  { %v3288_v26 = vsel %vm2541_vm7, %v2645_v27, %v2643_v6 }
 0xada   :  { %v1344_v46 = vadd.f32 %v1342_v15, %v3285_v36  ;;  %v3289_v36 = vsel %vm2541_vm7, %v2668_v31, %v2666_v37 }
 0xadc   :  { %2130 = vtanh.f32 %v1344_v46 }
 0xae2   :  { %v2129_v21 = vpop.eup %2128 }
 0xae3   :  { %1351 = vrot.lane.b32.xlu0 %v2129_v21, %s2184_s5 }
 0xae6   :  { %v2131_v39 = vpop.eup %2130 }
 0xae7   :  { %1353 = vrot.lane.b32.xlu0 %v2131_v39, %s2184_s5 }
 0xb55   :  { %v1352_v40 = vpop.permute.xlu0 %1351 }
 0xb56   :  { %v1357_v12 = vmul.f32 %v1352_v40, %v1347_v1 }
 0xb58   :  { %v1367_v38 = vadd.f32 %v1365_v4, %v1357_v12 }
 0xb59   :  { %v1354_v54 = vpop.permute.xlu0 %1353 }
 0xb5a   :  { %v1358_v20 = vmul.f32 %v1354_v54, %v1348_v42  ;;  %v1371_v57 = vsel %vm870_vm12, %v1367_v38, %v1360_v0  ;;  %v1369_v56 = vsel %vm884_vm13, %v1367_v38, %v1360_v0 }
 0xb5b   :  { %1383 = vrot.lane.b32.xlu1 %v1371_v57, %s2184_s5  ;;  %1375 = vrot.lane.b32.xlu0 %v1369_v56, %s2184_s5 }
 0xb5c   :  { %v1368_v61 = vadd.f32 %v1366_v2, %v1358_v20 }
 0xb5e   :  { %v1372_v13 = vsel %vm871_vm14, %v1368_v61, %v1362_v41  ;;  %v1370_v17 = vsel %vm885_vm15, %v1368_v61, %v1362_v41  ;;  %v1693_v61 = vstv %s3224_s0  ;;  %vm1806_vm14 = vcmask 261120  }
 0xb5f   :  { %1385 = vrot.lane.b32.xlu1 %v1372_v13, %s2184_s5  ;;  %1377 = vrot.lane.b32.xlu0 %v1370_v17, %s2184_s5  ;;  %v2156_v13 = vld [vmem:[%s3226_s2 + $0x8] sm:$0xff] }
 0xbcd   :  { %v1376_v51 = vpop.permute.xlu0 %1375  ;;  %v1384_v47 = vpop.permute.xlu1 %1383 }
 0xbce   :  { %v1389_v32 = vsel %vm354_vm0, %v1376_v51, %v1384_v47  ;;  %v3290_v51 = vmov 0  }
 0xbcf   :  { %1510 = vrot.lane.b32.xlu1 %v1389_v32, %s2184_s5  ;;  %1864 = vmatmul.mubr.msk.f32.vlgmr.msra.gmra.mrb[36].mxu0 %vm290_vm5, %v1389_v32 }
 0xbd0   :  { %1471 = vmatprep.mubr.f32.mxu0 %v3271_v23 }
 0xbd1   :  { %v1378_v58 = vpop.permute.xlu0 %1377  ;;  %v1386_v60 = vpop.permute.xlu1 %1385 }
 0xbd2   :  { %v1390_v53 = vsel %vm354_vm0, %v1378_v58, %v1386_v60  ;;  %v3291_v60 = vld [vmem:[#allocation10_spill] sm:$0xff] }
 0xbd3   :  { %1512 = vrot.lane.b32.xlu1 %v1390_v53, %s2184_s5  ;;  %1865 = vmatmul.mubr.msk.f32.gmra.mrb[38].mxu0 %vm290_vm5, %v1390_v53  ;;  %v3292_v53 = vld [vmem:[#allocation8_spill] sm:$0xff] }
 0xc41   :  { %v1511_v27 = vpop.permute.xlu1 %1510 }
 0xc45   :  { %v1513_v38 = vpop.permute.xlu1 %1512 }
 0xca2   :  { %v1467_v22 = vpop.f32.mrb[36].mxu0 }
 0xca3   :  { %v1468_v50 = vadd.f32 %v1467_v22, %v2606_v14  ;;  %v1469_v62 = vpop.f32.mrb[37].mxu0  ;;  %v3293_v22 = vsel %vm2507_vm6, %v3291_v60, %v3292_v53  ;;  %v3307_v60 = vld [vmem:[#allocation17_spill] sm:$0xff] }
 0xca4   :  { %v1470_v49 = vadd.f32 %v1469_v62, %v2697_v3 }
 0xca5   :  { %v1478_v25 = vadd.f32 %v1468_v50, %v3286_v24 }
 0xca6   :  { %v1473_v29 = vpop.f32.mrb[38].mxu0 }
 0xca7   :  { %v1866_v30 = vmul.f32 -1.442695, %v1478_v25  ;;  %v1474_v34 = vadd.f32 %v1473_v29, %v2606_v14  ;;  %v1475_v16 = vpop.f32.mrb[39].mxu0 }
 0xca8   :  { %v1476_v11 = vadd.f32 %v1475_v16, %v2697_v3 }
 0xca9   :  { %2132 = vpow2.f32 %v1866_v30  ;;  %v1479_v9 = vadd.f32 %v1474_v34, %v3287_v19  ;;  %v3294_v30 = vld [vmem:[#allocation11_spill] sm:$0xff]  ;;  %v3295_v34 = vld [vmem:[#allocation9_spill] sm:$0xff] }
 0xcaa   :  { %v3296_v16 = vsel %vm2507_vm6, %v3294_v30, %v3295_v34 }
 0xcab   :  { %v1867_v18 = vmul.f32 -1.442695, %v1479_v9 }
 0xcad   :  { %2134 = vpow2.f32 %v1867_v18 }
 0xcb3   :  { %v2133_v8 = vpop.eup %2132 }
 0xcb4   :  { %v1486_v59 = vadd.f32 1.0, %v2133_v8 }
 0xcb6   :  { %2136 = vrcp.f32 %v1486_v59 }
 0xcb7   :  { %v2135_v5 = vpop.eup %2134 }
 0xcb8   :  { %v1487_v7 = vadd.f32 1.0, %v2135_v5 }
 0xcba   :  { %2138 = vrcp.f32 %v1487_v7 }
 0xcc0   :  { %v2137_v55 = vpop.eup %2136 }
 0xcc1   :  { %v1492_v44 = vmul.f32 %v2137_v55, %v1470_v49  ;;  %v1498_v6 = vsub.f32 1.0, %v2137_v55  ;;  %v1516_v40 = vmul.f32 %v2137_v55, %v1511_v27  ;;  %v3297_v55 = vld [vmem:[#allocation13_spill] sm:$0xff] }
 0xcc3   :  { %v1494_v28 = vadd.f32 %v1492_v44, %v3288_v26  ;;  %v3299_v44 = vsel %vm2541_vm7, %v3297_v55, %v3298_v45 }
 0xcc4   :  { %v2139_v33 = vpop.eup %2138 }
 0xcc5   :  { %2140 = vtanh.f32 %v1494_v28  ;;  %v1493_v15 = vmul.f32 %v2139_v33, %v1476_v11  ;;  %v1499_v4 = vsub.f32 1.0, %v2139_v33  ;;  %v1517_v54 = vmul.f32 %v2139_v33, %v1513_v38 }
 0xcc7   :  { %v1495_v46 = vadd.f32 %v1493_v15, %v3289_v36  ;;  %v3300_v15 = vld [vmem:[#allocation15_spill] sm:$0xff]  ;;  %v3301_v36 = vld [vmem:[#allocation14_spill] sm:$0xff] }
 0xcc9   :  { %2142 = vtanh.f32 %v1495_v46  ;;  %v3302_v46 = vsel %vm2541_vm7, %v3300_v15, %v3301_v36 }
 0xccf   :  { %v2141_v21 = vpop.eup %2140 }
 0xcd0   :  { %1502 = vrot.lane.b32.xlu0 %v2141_v21, %s2184_s5 }
 0xcd3   :  { %v2143_v39 = vpop.eup %2142 }
 0xcd4   :  { %1504 = vrot.lane.b32.xlu0 %v2143_v39, %s2184_s5 }
 0xd42   :  { %v1503_v0 = vpop.permute.xlu0 %1502 }
 0xd43   :  { %v1508_v1 = vmul.f32 %v1503_v0, %v1498_v6  ;;  %v1711_v0 = vld [vmem:[%s3230_s6 + $0x8] sm:$0xff] }
 0xd45   :  { %v1518_v12 = vadd.f32 %v1516_v40, %v1508_v1  ;;  %v1712_v1 = vld [vmem:[%s3230_s6 + $0x10] sm:$0xff]  ;;  %v2036_v40 = vpack.c.bf16 %v1711_v0, %v1710_v10 }
 0xd46   :  { %v1505_v42 = vpop.permute.xlu0 %1504 }
 0xd47   :  { %v1509_v41 = vmul.f32 %v1505_v42, %v1499_v4  ;;  %v1522_v37 = vsel %vm687_vm1, %v1518_v12, %v1511_v27  ;;  %v1520_v31 = vsel %vm701_vm2, %v1518_v12, %v1511_v27  ;;  %vm1695_vm1 = vcmp.eq.s32.totalorder %v2156_v13, %v1693_v61  ;;  %v2157_v27 = vld [vmem:[%s3226_s2] sm:$0xff]  ;;  %v1713_v12 = vld [vmem:[%s3230_s6 + $0x18] sm:$0xff]  ;;  %v1715_v42 = vld [vmem:[%s3230_s6 + $0x28] sm:$0xff]  ;;  %2037 = vmatprep.subr.bf16.mxu0 %v2036_v40 }
 0xd48   :  { %1534 = vrot.lane.b32.xlu1 %v1522_v37, %s2184_s5  ;;  %1526 = vrot.lane.b32.xlu0 %v1520_v31, %s2184_s5  ;;  %v1697_v47 = vsel %vm1695_vm1, 1, %v3290_v51  ;;  %vm1694_vm6 = vcmp.eq.s32.totalorder %v2157_v27, %v1693_v61  ;;  %v2040_v4 = vpack.c.bf16 %v1713_v12, %v1712_v1  ;;  %v1717_v37 = vld [vmem:[%s3230_s6 + $0x38] sm:$0xff] }
 0xd49   :  { %v1519_v20 = vadd.f32 %v1517_v54, %v1509_v41  ;;  %2039 = vmatpush3.bf16.msra.mxu0 %v2036_v40  ;;  %v1716_v54 = vld [vmem:[%s3230_s6 + $0x30] sm:$0xff] }
 0xd4a   :  { %2041 = vmatprep.subr.bf16.mxu0 %v2040_v4  ;;  %v2048_v31 = vpack.c.bf16 %v1717_v37, %v1716_v54 }
 0xd4b   :  { %v1523_v2 = vsel %vm688_vm3, %v1519_v20, %v1513_v38  ;;  %v1521_v57 = vsel %vm702_vm4, %v1519_v20, %v1513_v38  ;;  %v1714_v38 = vld [vmem:[%s3230_s6 + $0x20] sm:$0xff]  ;;  %vm3308_vm3 = vcmp.eq.s32.totalorder %v3307_v60, 1 }
 0xd4c   :  { %1536 = vrot.lane.b32.xlu1 %v1523_v2, %s2184_s5  ;;  %1528 = vrot.lane.b32.xlu0 %v1521_v57, %s2184_s5  ;;  %v2044_v41 = vpack.c.bf16 %v1715_v42, %v1714_v38 }
 0xd4d   :  { %2043 = vmatpush3.bf16.msra.mxu0 %v2040_v4 }
 0xd4e   :  { %2045 = vmatprep.subr.bf16.mxu0 %v2044_v41 }
 0xd51   :  { %2047 = vmatpush3.bf16.msra.mxu0 %v2044_v41 }
 0xd52   :  { %2049 = vmatprep.subr.bf16.mxu0 %v2048_v31 }
 0xd55   :  { %2051 = vmatpush3.bf16.msra.mxu0 %v2048_v31 }
 0xdba   :  { %v1527_v43 = vpop.permute.xlu0 %1526  ;;  %v1535_v56 = vpop.permute.xlu1 %1534 }
 0xdbb   :  { %v1540_v63 = vsel %vm354_vm0, %v1527_v43, %v1535_v56 }
 0xdbc   :  { %1661 = vrot.lane.b32.xlu1 %v1540_v63, %s2184_s5  ;;  %1868 = vmatmul.mubr.msk.f32.vlgmr.msra.gmra.mrb[20].mxu1 %vm290_vm5, %v1540_v63 }
 0xdbd   :  { %1622 = vmatprep.mubr.f32.mxu1 %v3271_v23 }
 0xdbe   :  { %v1529_v52 = vpop.permute.xlu0 %1528  ;;  %v1537_v48 = vpop.permute.xlu1 %1536 }
 0xdbf   :  { %v1541_v17 = vsel %vm354_vm0, %v1529_v52, %v1537_v48 }
 0xdc0   :  { %1663 = vrot.lane.b32.xlu1 %v1541_v17, %s2184_s5  ;;  %1869 = vmatmul.mubr.msk.f32.gmra.mrb[22].mxu1 %vm290_vm5, %v1541_v17 }
 0xdc4   :  { %1702 = vperm.xlu1 %2059, %v1697_v47  }
 0xe2e   :  { %v1662_v20 = vpop.permute.xlu1 %1661 }
 0xe32   :  { %v1664_v52 = vpop.permute.xlu1 %1663 }
 0xe8f   :  { %v1618_v32 = vpop.f32.mrb[20].mxu1 }
 0xe90   :  { %v1619_v23 = vadd.f32 %v1618_v32, %v2606_v14  ;;  %v1620_v58 = vpop.f32.mrb[21].mxu1  ;;  %v3305_v32 = vld [vmem:[#allocation18_spill] sm:$0xff] }
 0xe91   :  { %v1621_v7 = vadd.f32 %v1620_v58, %v2697_v3  ;;  %vm3306_vm2 = vcmp.eq.s32.totalorder %v3305_v32, 1 }
 0xe92   :  { %v1629_v50 = vadd.f32 %v1619_v23, %v3293_v22  ;;  %v3309_v22 = vld [vmem:[#allocation19_spill] sm:$0xff] }
 0xe93   :  { %v1624_v62 = vpop.f32.mrb[22].mxu1  ;;  %vm3310_vm4 = vcmp.eq.s32.totalorder %v3309_v22, 1 }
 0xe94   :  { %v1870_v24 = vmul.f32 -1.442695, %v1629_v50  ;;  %v1625_v25 = vadd.f32 %v1624_v62, %v2606_v14  ;;  %v1626_v29 = vpop.f32.mrb[23].mxu1  ;;  %v1703_v62 = vpop.permute.xlu1 %1702 }
 0xe95   :  { %v1627_v28 = vadd.f32 %v1626_v29, %v2697_v3  ;;  %v1696_v3 = vsel %vm1694_vm6, 1, %v3290_v51  ;;  %v3303_v51 = vld [vmem:[#allocation16_spill] sm:$0xff]  ;;  %vm1705_vm13 = vcmp.eq.s32.totalorder %v1703_v62, 1 }
 0xe96   :  { %2144 = vpow2.f32 %v1870_v24  ;;  %v1630_v19 = vadd.f32 %v1625_v25, %v3296_v16  ;;  %vm3304_vm7 = vcmp.eq.s32.totalorder %v3303_v51, 1 }
 0xe98   :  { %v1871_v9 = vmul.f32 -1.442695, %v1630_v19 }
 0xe9a   :  { %2146 = vpow2.f32 %v1871_v9 }
 0xea0   :  { %v2145_v18 = vpop.eup %2144 }
 0xea1   :  { %v1637_v8 = vadd.f32 1.0, %v2145_v18 }
 0xea3   :  { %2148 = vrcp.f32 %v1637_v8 }
 0xea4   :  { %v2147_v59 = vpop.eup %2146 }
 0xea5   :  { %v1638_v5 = vadd.f32 1.0, %v2147_v59 }
 0xea7   :  { %2150 = vrcp.f32 %v1638_v5  ;;  %v1872_v5 = vld [vmem:[%s3231_s7] ss:$0 sm:$0xff] }
 0xead   :  { %v2149_v49 = vpop.eup %2148 }
 0xeae   :  { %v1643_v14 = vmul.f32 %v2149_v49, %v1621_v7  ;;  %v1649_v2 = vsub.f32 1.0, %v2149_v49  ;;  %v1667_v56 = vmul.f32 %v2149_v49, %v1662_v20 }
 0xeb0   :  { %v1645_v26 = vadd.f32 %v1643_v14, %v3299_v44 }
 0xeb1   :  { %v2151_v11 = vpop.eup %2150 }
 0xeb2   :  { %2152 = vtanh.f32 %v1645_v26  ;;  %v1644_v33 = vmul.f32 %v2151_v11, %v1627_v28  ;;  %v1650_v61 = vsub.f32 1.0, %v2151_v11  ;;  %v1668_v17 = vmul.f32 %v2151_v11, %v1664_v52 }
 0xeb4   :  { %v1646_v21 = vadd.f32 %v1644_v33, %v3302_v46 }
 0xeb6   :  { %2154 = vtanh.f32 %v1646_v21 }
 0xebc   :  { %v2153_v39 = vpop.eup %2152 }
 0xebd   :  { %1653 = vrot.lane.b32.xlu0 %v2153_v39, %s2184_s5 }
 0xec0   :  { %v2155_v6 = vpop.eup %2154 }
 0xec1   :  { %1655 = vrot.lane.b32.xlu0 %v2155_v6, %s2184_s5 }
 0xec5   :  { %1699 = vperm.xlu0 %2058, %v1696_v3  }
 0xf2f   :  { %v1654_v57 = vpop.permute.xlu0 %1653 }
 0xf30   :  { %v1659_v43 = vmul.f32 %v1654_v57, %v1649_v2 }
 0xf32   :  { %v1669_v63 = vadd.f32 %v1667_v56, %v1659_v43 }
 0xf33   :  { %v1656_v48 = vpop.permute.xlu0 %1655 }
 0xf34   :  { %v1660_v13 = vmul.f32 %v1656_v48, %v1650_v61  ;;  %v1673_v47 = vsel %vm3304_vm7, %v1669_v63, %v1662_v20  ;;  %v1671_v23 = vsel %vm3306_vm2, %v1669_v63, %v1662_v20 }
 0xf35   :  { %1685 = vrot.lane.b32.xlu1 %v1673_v47, %s2184_s5  ;;  %1677 = vrot.lane.b32.xlu0 %v1671_v23, %s2184_s5 }
 0xf36   :  { %v1670_v58 = vadd.f32 %v1668_v17, %v1660_v13 }
 0xf38   :  { %v1674_v53 = vsel %vm3308_vm3, %v1670_v58, %v1664_v52  ;;  %v1672_v50 = vsel %vm3310_vm4, %v1670_v58, %v1664_v52 }
 0xf39   :  { %1687 = vrot.lane.b32.xlu1 %v1674_v53, %s2184_s5  ;;  %1679 = vrot.lane.b32.xlu0 %v1672_v50, %s2184_s5 }
 0xf44   :  { %v1700_v24 = vpop.permute.xlu0 %1699 }
 0xf45   :  { %vm1704_vm12 = vcmp.eq.s32.totalorder %v1700_v24, 1 }
 0xfa7   :  { %v1678_v25 = vpop.permute.xlu0 %1677  ;;  %v1686_v29 = vpop.permute.xlu1 %1685 }
 0xfa8   :  { %v1691_v30 = vsel %vm354_vm0, %v1678_v25, %v1686_v29 }
 0xfa9   :  { %v1706_v34 = vsel %vm1704_vm12, %v1691_v30, 0.0 }
 0xfaa   :  { %v1708_v16 = vsel %vm354_vm0, %v1706_v34, %v1686_v29 }
 0xfab   :  { %v1680_v19 = vpop.permute.xlu0 %1679  ;;  %1901 = vmatprep.mubr.msk.f32.mxu0 %vm290_vm5, %v1708_v16  ;;  %v1688_v9 = vpop.permute.xlu1 %1687 }
 0xfac   :  { %v1692_v18 = vsel %vm354_vm0, %v1680_v19, %v1688_v9 }
 0xfad   :  { %v1707_v8 = vsel %vm1705_vm13, %v1692_v18, 0.0 }
 0xfae   :  { %v1709_v59 = vsel %vm354_vm0, %v1707_v8, %v1688_v9 }
 0xfaf   :  { %1902 = vmatmul.mubr.msk.f32.vlgmr.msra.gmra.mrb[40].mxu0 %vm290_vm5, %v1709_v59 }
0x1082   :  { %v1903_v7 = vpop.f32.mrb[40].mxu0 }
0x1083   :  { %v1803_v49 = vadd.f32 %v1903_v7, %v1872_v5  ;;  %v1797_v14 = vpop.f32.mrb[41].mxu0 }
0x1084   :  { %v1798_v55 = vadd.f32 %v1872_v5, %v1797_v14 }
0x1085   :  { %1808 = vst.msk [vmem:[#allocation5 + $0x8] sm:$0xff] %vm1806_vm14, %v1803_v49 }
0x1086   :  { %1807 = vst.msk [vmem:[#allocation5] sm:$0xff] %vm1806_vm14, %v1798_v55 }
0x1087   :  { %2169 = shalt.err (!%p2166_p4)
}
0x1088   :  { %s2170_s7 = scalar_lea.hbm %s3232_s8, 256 }
0x1089   :  { %p2171_p5 = scmp.ne.s32.totalorder %s3232_s8, %s2170_s7  ;;  %p2174_p6 = scmp.lt.u32.totalorder %s2170_s7, %s3232_s8 }
0x108b   :  { %p2176_p7 = pnand %p2174_p6, %p2171_p5 }
0x108d   :  { %2179 = shalt.err (!%p2176_p7)
}
0x108e   :  { %s2186_s0 = smov 128   ;;  %s2187_s17 = smov 8  }
0x108f   :  { %1820 = dma.vmem_to_hbm [thread:$0]  %s1815_s10, 256, %s3232_s8, [#allocation6], %s2186_s0, %s2186_s0, %s2187_s17  }
0x1090   :  { %2180 = dma.done.wait [#allocation6], 256  }
0x1091   :  { %2181 = vsyncadd [#allocation6], 4294967040 }
0x1092   :  { %1824 = vsyncpa [#allocation6], 1 }

</bundles_post_ra>
